<compile_context>
chip_gen: v6e
topology: v6e:2x2x1
jax: 0.10.0
libtpu: 0.0.40
codegen_flags: <defaults>
</compile_context>

<pallas_src>
import functools

import jax
import jax.numpy as jnp
from jax.experimental import pallas as pl
from jax.experimental.pallas import tpu as pltpu


def _round_up(x, m):
    return (x + m - 1) // m * m


def _conv3_relu_kernel(x_ref, w_ref, b_ref, o_ref, *, row_stride, tm):
    """One (batch, M-chunk) grid step.

    x_ref : (1, rows, 3*Cin) bf16  -- W-im2col'd, H-padded image; row index is
                                      h*row_stride + w; VMEM-resident across M steps.
    w_ref : (3, 3*Cin, Cout)  bf16 -- one weight slab per kh.
    b_ref : (1, Cout)         f32
    o_ref : (1, tm, Cout)     bf16 -- lane-dense output chunk for this grid step.
    """
    cout = o_ref.shape[2]
    m0 = pl.program_id(1) * tm                          # flattened (h, w) chunk offset
    acc = jnp.zeros((tm, cout), jnp.float32)            # register accumulator (16 vregs)
    for kh in range(3):                                 # 3 contiguous-LHS matmuls, K = 3*Cin
        start = pl.multiple_of(kh * row_stride + m0, 16)  # 16-aligned bf16 sublane slice
        patch = x_ref[0, pl.ds(start, tm), :]
        acc = acc + jnp.dot(patch, w_ref[kh], preferred_element_type=jnp.float32)
    o_ref[0, :, :] = jnp.maximum(acc + b_ref[...], 0.0).astype(o_ref.dtype)


def conv3_forward_nhwc(x_nhwc, w_oihw, b, *, out_dtype=jnp.bfloat16, tm=128):
    """Conv2d(Cin -> Cout, 3x3, stride=1, padding=1) + ReLU on NHWC input.

    Returns NHWC output (lane-dense, Cout last), dtype `out_dtype`.
    """
    B, H, W, Cin = x_nhwc.shape
    Cout = w_oihw.shape[0]
    K = 3 * Cin

    # --- padded geometry: keeps all slices 16-aligned and the accumulator at tm rows ---
    w_pad = _round_up(W, 16)            # padded row stride (garbage cols sliced off later)
    m_valid = H * w_pad                 # flattened valid output rows (in padded width)
    m_pad = _round_up(m_valid, tm)      # padded flattened output rows
    rows = m_pad + 2 * w_pad            # rows the kernel may touch (incl. kh=2 halo)

    # ---- layout prep (intended to fuse into one XLA producer feeding the kernel) ----
    # TODO(synk): verify in HLO/xprof that cast+pad+concat+reshape fuse; if the im2col
    # intermediate materializes in HBM, accept bf16 NHWC activations upstream and fold
    # the kw-concat into the previous layer's epilogue.
    x = x_nhwc.astype(jnp.bfloat16)
    x = jnp.pad(x, ((0, 0), (1, 1), (1, w_pad + 1 - W), (0, 0)))   # -> (H+2, w_pad+2, Cin)
    # kw-fold: x_w3[b, h, w, kw*Cin + c] = x_pad[b, h, w + kw, c]
    x_w3 = jnp.concatenate([x[:, :, kw:kw + w_pad, :] for kw in range(3)], axis=-1)
    x_flat = x_w3.reshape(B, (H + 2) * w_pad, K)
    if rows > (H + 2) * w_pad:
        x_flat = jnp.pad(x_flat, ((0, 0), (0, rows - (H + 2) * w_pad), (0, 0)))

    # (Cout, Cin, kh, kw) -> (kh, kw*Cin + c, Cout), matching x_w3's K ordering.
    w_k = jnp.transpose(w_oihw, (2, 3, 1, 0)).reshape(3, K, Cout).astype(jnp.bfloat16)
    b_k = b.reshape(1, Cout).astype(jnp.float32)

    # --- VMEM guard: whole image resident per step + double-buffered small blocks ---
    est = (2 * rows * K * 2                                    # x (bf16, double-buffered)
           + 2 * 3 * K * Cout * 2                              # weights (bf16)
           + 2 * Cout * 4                                      # bias (f32)
           + 2 * tm * Cout * jnp.dtype(out_dtype).itemsize)    # output chunk
    budget = int(est * 1.25)
    if budget > 64 * 1024 * 1024:   # conservative: v7x physical VMEM per TensorCore
        # TODO(synk): add an H-chunk grid axis with a 2-row halo for feature maps this big.
        raise NotImplementedError(
            f"Conv3 Pallas kernel needs ~{est / 2**20:.1f} MiB VMEM; add H tiling first.")
    vmem_limit = min(max(budget, 32 * 1024 * 1024), 64 * 1024 * 1024)

    out_flat = pl.pallas_call(
        functools.partial(_conv3_relu_kernel, row_stride=w_pad, tm=tm),
        out_shape=jax.ShapeDtypeStruct((B, m_pad, Cout), out_dtype),
        grid_spec=pltpu.PrefetchScalarGridSpec(
            num_scalar_prefetch=0,
            grid=(B, m_pad // tm),
            in_specs=[
                # Image block index is independent of the M axis -> stays VMEM-resident
                # (no re-DMA across M steps for the same batch element).
                pl.BlockSpec((1, rows, K), lambda bi, mi: (bi, 0, 0)),
                pl.BlockSpec((3, K, Cout), lambda bi, mi: (0, 0, 0)),
                pl.BlockSpec((1, Cout), lambda bi, mi: (0, 0)),
            ],
            out_specs=pl.BlockSpec((1, tm, Cout), lambda bi, mi: (bi, mi, 0)),
        ),
        compiler_params=pltpu.CompilerParams(
            dimension_semantics=("parallel", "parallel"),   # B and M chunks shard across TCs
            vmem_limit_bytes=vmem_limit),
    )(x_flat, w_k, b_k)

    # Drop padded tail rows / padded width columns.
    out = out_flat[:, :m_valid, :].reshape(B, H, w_pad, Cout)[:, :, :W, :]
    return out


def conv3_forward(x_nchw, w_oihw, b, *, out_dtype=jnp.bfloat16, nchw_output=False):
    """PyTorch Conv3.forward semantics: Conv2d(Cin->128, 3x3, pad=1) + ReLU on NCHW input.

    By default returns channels-last (NHWC, lane-dense) activations; request
    nchw_output=True only at the model boundary (the NCHW layout has a lane dim
    of W < 128 and its transpose can cost as much as the conv itself at 16x16).
    """
    x_nhwc = jnp.transpose(x_nchw, (0, 2, 3, 1))
    out = conv3_forward_nhwc(x_nhwc, w_oihw, b, out_dtype=out_dtype)
    if nchw_output:
        out = jnp.transpose(out, (0, 3, 1, 2))
    return out


if __name__ == "__main__":
    key = jax.random.PRNGKey(0)
    kx, kw, kb = jax.random.split(key, 3)

    B, Cin, H, W, Cout = 2, 130, 16, 16, 128            # module default input_dim=130
    x = jax.random.normal(kx, (B, Cin, H, W), jnp.float32)

    # Deterministic synthetic parameters (PyTorch-like uniform fan-in scaling).
    fan_in = Cin * 3 * 3
    bound = 1.0 / jnp.sqrt(jnp.float32(fan_in))
    w = jax.random.uniform(kw, (Cout, Cin, 3, 3), jnp.float32, -bound, bound)
    b = jax.random.uniform(kb, (Cout,), jnp.float32, -bound, bound)

    out_nhwc = conv3_forward(x, w, b)                    # lane-dense NHWC bf16 (default)
    jax.block_until_ready(out_nhwc)

    # Reference: full-f32 XLA convolution (same semantics as nn.Conv2d + ReLU).
    ref = jax.lax.conv_general_dilated(
        x, w, window_strides=(1, 1), padding=((1, 1), (1, 1)),
        dimension_numbers=("NCHW", "OIHW", "NCHW"))
    ref = jnp.maximum(ref + b.reshape(1, Cout, 1, 1), 0.0)
    ref_nhwc = jnp.transpose(ref, (0, 2, 3, 1))

    # bf16 activations/weights on the MXU (f32 accumulate) + bf16 output rounding:
    # expected max abs error ~1e-2..2e-2 for K=1170 reductions.
    max_err = float(jnp.max(jnp.abs(out_nhwc.astype(jnp.float32) - ref_nhwc)))
    assert max_err < 1e-1, f"mismatch vs reference conv: max_err={max_err}"

    print("KERNEL_OK")
</pallas_src>

<mosaic_0001>
module attributes {stable_mosaic.version = 11 : i64} {
  func.func @_conv3_relu_kernel(%arg0: i32, %arg1: i32, %arg2: memref<1x288x390xbf16, #tpu.memory_space<vmem>>, %arg3: memref<3x390x128xbf16, #tpu.memory_space<vmem>>, %arg4: memref<1x128xf32, #tpu.memory_space<vmem>>, %arg5: memref<1x128x128xbf16, #tpu.memory_space<vmem>>) attributes {dimension_semantics = [#tpu.dimension_semantics<parallel>, #tpu.dimension_semantics<parallel>], iteration_bounds = array<i64: 2, 2>, scalar_prefetch = 0 : i64, scratch_operands = 0 : i64, tpu.core_type = #tpu.core_type<tc>, window_params = [{transform_indices = @transform_0, window_bounds = array<i64: 1, 288, 390>}, {pipeline_mode = #tpu.pipeline_mode<synchronous>, transform_indices = @transform_1, window_bounds = array<i64: 3, 390, 128>}, {pipeline_mode = #tpu.pipeline_mode<synchronous>, transform_indices = @transform_2, window_bounds = array<i64: 1, 128>}, {transform_indices = @transform_3, window_bounds = array<i64: 1, 128, 128>}]} {
    %c128_i32 = arith.constant 128 : i32
    %0 = arith.muli %arg1, %c128_i32 : i32
    %cst = arith.constant 0.000000e+00 : f32
    %1 = vector.broadcast %cst : f32 to vector<128x128xf32>
    %c0_i32 = arith.constant 0 : i32
    %2 = arith.addi %c0_i32, %0 : i32
    %3 = tpu.assume_multiple %2, 16 : i32
    %c0 = arith.constant 0 : index
    %4 = arith.index_cast %3 : i32 to index
    %c0_0 = arith.constant 0 : index
    %5 = vector.load %arg2[%c0, %4, %c0_0] : memref<1x288x390xbf16, #tpu.memory_space<vmem>>, vector<1x128x390xbf16>
    %6 = vector.shape_cast %5 : vector<1x128x390xbf16> to vector<128x390xbf16>
    %c0_1 = arith.constant 0 : index
    %c0_2 = arith.constant 0 : index
    %c0_3 = arith.constant 0 : index
    %7 = vector.load %arg3[%c0_1, %c0_2, %c0_3] : memref<3x390x128xbf16, #tpu.memory_space<vmem>>, vector<1x390x128xbf16>
    %8 = vector.shape_cast %7 : vector<1x390x128xbf16> to vector<390x128xbf16>
    %cst_4 = arith.constant dense<0.000000e+00> : vector<128x128xf32>
    %9 = tpu.matmul %6, %8, %cst_4 {dimension_numbers = #tpu.dot_dimension_numbers<[1], [0], [0], [1], [0, 0, 1, 1], [], []>} : vector<128x390xbf16>, vector<390x128xbf16>, vector<128x128xf32> -> vector<128x128xf32>
    %10 = arith.addf %1, %9 : vector<128x128xf32>
    %c16_i32 = arith.constant 16 : i32
    %11 = arith.addi %c16_i32, %0 : i32
    %12 = tpu.assume_multiple %11, 16 : i32
    %c0_5 = arith.constant 0 : index
    %13 = arith.index_cast %12 : i32 to index
    %c0_6 = arith.constant 0 : index
    %14 = vector.load %arg2[%c0_5, %13, %c0_6] : memref<1x288x390xbf16, #tpu.memory_space<vmem>>, vector<1x128x390xbf16>
    %15 = vector.shape_cast %14 : vector<1x128x390xbf16> to vector<128x390xbf16>
    %c1 = arith.constant 1 : index
    %c0_7 = arith.constant 0 : index
    %c0_8 = arith.constant 0 : index
    %16 = vector.load %arg3[%c1, %c0_7, %c0_8] : memref<3x390x128xbf16, #tpu.memory_space<vmem>>, vector<1x390x128xbf16>
    %17 = vector.shape_cast %16 : vector<1x390x128xbf16> to vector<390x128xbf16>
    %cst_9 = arith.constant dense<0.000000e+00> : vector<128x128xf32>
    %18 = tpu.matmul %15, %17, %cst_9 {dimension_numbers = #tpu.dot_dimension_numbers<[1], [0], [0], [1], [0, 0, 1, 1], [], []>} : vector<128x390xbf16>, vector<390x128xbf16>, vector<128x128xf32> -> vector<128x128xf32>
    %19 = arith.addf %10, %18 : vector<128x128xf32>
    %c32_i32 = arith.constant 32 : i32
    %20 = arith.addi %c32_i32, %0 : i32
    %21 = tpu.assume_multiple %20, 16 : i32
    %c0_10 = arith.constant 0 : index
    %22 = arith.index_cast %21 : i32 to index
    %c0_11 = arith.constant 0 : index
    %23 = vector.load %arg2[%c0_10, %22, %c0_11] : memref<1x288x390xbf16, #tpu.memory_space<vmem>>, vector<1x128x390xbf16>
    %24 = vector.shape_cast %23 : vector<1x128x390xbf16> to vector<128x390xbf16>
    %c2 = arith.constant 2 : index
    %c0_12 = arith.constant 0 : index
    %c0_13 = arith.constant 0 : index
    %25 = vector.load %arg3[%c2, %c0_12, %c0_13] : memref<3x390x128xbf16, #tpu.memory_space<vmem>>, vector<1x390x128xbf16>
    %26 = vector.shape_cast %25 : vector<1x390x128xbf16> to vector<390x128xbf16>
    %cst_14 = arith.constant dense<0.000000e+00> : vector<128x128xf32>
    %27 = tpu.matmul %24, %26, %cst_14 {dimension_numbers = #tpu.dot_dimension_numbers<[1], [0], [0], [1], [0, 0, 1, 1], [], []>} : vector<128x390xbf16>, vector<390x128xbf16>, vector<128x128xf32> -> vector<128x128xf32>
    %28 = arith.addf %19, %27 : vector<128x128xf32>
    %c0_15 = arith.constant 0 : index
    %c0_16 = arith.constant 0 : index
    %29 = vector.load %arg4[%c0_15, %c0_16] : memref<1x128xf32, #tpu.memory_space<vmem>>, vector<1x128xf32>
    %30 = vector.broadcast %29 : vector<1x128xf32> to vector<128x128xf32>
    %31 = arith.addf %28, %30 : vector<128x128xf32>
    %cst_17 = arith.constant 0.000000e+00 : f32
    %32 = vector.broadcast %cst_17 : f32 to vector<128x128xf32>
    %33 = arith.maximumf %31, %32 : vector<128x128xf32>
    %34 = arith.truncf %33 : vector<128x128xf32> to vector<128x128xbf16>
    %c0_18 = arith.constant 0 : index
    %c0_19 = arith.constant 0 : index
    %c0_20 = arith.constant 0 : index
    %35 = vector.load %arg5[%c0_18, %c0_19, %c0_20] : memref<1x128x128xbf16, #tpu.memory_space<vmem>>, vector<1x128x128xbf16>
    %36 = vector.shape_cast %35 : vector<1x128x128xbf16> to vector<128x128xbf16>
    %37 = vector.shape_cast %34 : vector<128x128xbf16> to vector<1x128x128xbf16>
    tpu.vector_store %arg5[%c0_18, %c0_19, %c0_20], %37 {strides = array<i32>} : memref<1x128x128xbf16, #tpu.memory_space<vmem>>, vector<1x128x128xbf16>,
    return
  }
  func.func @transform_0(%arg0: i32, %arg1: i32) -> (i32, i32, i32) {
    %c0_i32 = arith.constant 0 : i32
    %c0_i32_0 = arith.constant 0 : i32
    %c0_i32_1 = arith.constant 0 : i32
    return %arg0, %c0_i32, %c0_i32_0 : i32, i32, i32
  }
  func.func @transform_1(%arg0: i32, %arg1: i32) -> (i32, i32, i32) {
    %c0_i32 = arith.constant 0 : i32
    %c0_i32_0 = arith.constant 0 : i32
    %c0_i32_1 = arith.constant 0 : i32
    %c0_i32_2 = arith.constant 0 : i32
    return %c0_i32, %c0_i32_0, %c0_i32_1 : i32, i32, i32
  }
  func.func @transform_2(%arg0: i32, %arg1: i32) -> (i32, i32) {
    %c0_i32 = arith.constant 0 : i32
    %c0_i32_0 = arith.constant 0 : i32
    %c0_i32_1 = arith.constant 0 : i32
    return %c0_i32, %c0_i32_0 : i32, i32
  }
  func.func @transform_3(%arg0: i32, %arg1: i32) -> (i32, i32, i32) {
    %c0_i32 = arith.constant 0 : i32
    %c0_i32_0 = arith.constant 0 : i32
    return %arg0, %arg1, %c0_i32 : i32, i32, i32
  }
}

</mosaic_0001>

<bundles_post_ra>
// kernel: tpu_custom_call.1
= control target key start
LH: loop header
LB: loop body
LE: loop exit
PB: predicated region body
PF: predicated region fallthrough
CT: control target
= control target key end

     0   :  { %s3860_s0 = inlined_call_operand.hbm [shape: bf16[2,288,390], index: 0, kind: input, shape index: {}]   ;;  %s3861_s1 = inlined_call_operand.hbm [shape: bf16[3,390,128], index: 1, kind: input, shape index: {}]   ;;  %s3862_s2 = inlined_call_operand.vmem [shape: f32[1,128], index: 2, kind: input, shape index: {}]   ;;  %s3863_s3 = inlined_call_operand.hbm [shape: bf16[2,256,128], index: 3, kind: output, shape index: {}]  }
   0x1   :  { %3871 = sst [smem:[#allocation16_spill]] %s3861_s1 }
   0x2   :  { %3872 = sst [smem:[#allocation17_spill]] %s3863_s3 }
   0x3   :  { %8 = vsyncpa [#allocation3], 0 }
   0x4   :  { %10 = vsyncpa [#allocation3 + $0x1], 0 }
   0x5   :  { %11 = vsyncpa [#allocation6], 0 }
   0x6   :  { %12 = vsyncpa [#allocation4], 0 }
   0x7   :  { %14 = vsyncpa [#allocation4 + $0x1], 0  ;;  %s3343_s12 = smov 0   ;;  %s3345_s13 = smov 0  }
   0x8   :  { %s3347_s14 = smov 0   ;;  %s3349_s15 = smov 0  }
   0x9   :  { %s3351_s16 = smov 0   ;;  %s3353_s17 = smov 0  }
   0xa   :  { %s3355_s18 = smov 0   ;;  %s3357_s19 = smov 0  }
   0xb   :  { %s3359_s20 = smov 0   ;;  %s3361_s21 = smov 0  }
   0xc   :  { %s3363_s22 = smov 0  }
   0xd LB: > { %3873 = sst [smem:[#allocation11_spill]] %s3271_s12  ;;  %s2299_s23 = sadd.s32 4294967295, %s3311_s22   ;;  %s3311_s22 = sphi %s3363_s22, %s20_s22   ;;  %s3307_s21 = sphi %s3361_s21, %s3901_s21   ;;  %s3303_s20 = sphi %s3359_s20, %s3892_s20   ;;  %s3299_s19 = sphi %s3357_s19, %s3900_s19   ;;  %s3295_s18 = sphi %s3355_s18, %s3891_s18   ;;  %s3291_s17 = sphi %s3353_s17, %s3899_s17   ;;  %s3287_s16 = sphi %s3351_s16, %s3898_s16   ;;  %s3283_s15 = sphi %s3349_s15, %s3897_s15   ;;  %s3279_s14 = sphi %s3347_s14, %s3896_s14   ;;  %s3275_s13 = sphi %s3345_s13, %s3895_s13   ;;  %s3271_s12 = sphi %s3343_s12, %s3894_s12  }
   0xe   : > { %3874 = sst [smem:[#allocation12_spill]] %s3303_s20  ;;  %s2300_s24 = sadd.s32 4294967294, %s3311_s22  }
   0xf   : > { %p52_p0 = scmp.ne.s32.totalorder %s3287_s16, %s3283_s15  ;;  %p3399_p1 = scmp.eq.s32.totalorder %s2299_s23, 0 }
  0x10   : > { %s109_s26 = sadd.s32 1, %s3279_s14  ;;  %p119_p2 = scmp.ne.s32.totalorder %s3279_s14, %s3275_s13 }
  0x11   : > { %p3408_p3 = por %p3399_p1, %p52_p0  ;;  %p120_p4 = scmp.eq.s32.totalorder %s2299_s23, 3 }
  0x12   : > { %p125_p5 = scmp.ne.s32.totalorder %s3275_s13, %s3271_s12  ;;  %p126_p6 = scmp.eq.s32.totalorder %s2300_s24, 3 }
  0x13   : > { %p3414_p7 = por %p120_p4, %p119_p2  ;;  %p2301_p8 = scmp.ge.s32.totalorder %s3311_s22, 1 }
  0x14   : > { %p3419_p9 = por %p126_p6, %p125_p5  ;;  %p133_p10 = scmp.lt.s32.totalorder %s3311_s22, 5 }
  0x15   : > { %s3877_s28 = scalar_select %p3414_p7, 1, 0 }
  0x16   : > { %s3878_s29 = scalar_select %p3419_p9, 1, 0 }
  0x17   : > { %p3424_p11 = pnand %p2301_p8, %p133_p10  ;;  %s3313_s4 = smov [#allocation5]  }
  0x18   : > { %3879 = sst [smem:[#allocation13_spill]] %s3878_s29  ;;  %s145_s5 = sshll.u32 %s3313_s4, 4  ;;  %s146_s5 = int_to_ptr.vmem [resolvable:$true] %s145_s5 }
  0x19   : > { %p2802_p12 = pneg %p3424_p11  ;;  %s3144_s6 = scalar_lea.vmem %s146_s5, 9408 }
  0x1a   : > { %p3145_p2 = scmp.ne.s32.totalorder %s146_s5, %s3144_s6  ;;  %p3152_p6 = scmp.lt.s32.totalorder %s146_s5, %s146_s5 }
  0x1b   : > { %p2803_p13 = pnand %p2802_p12, %p3399_p1  ;;  %p3153_p9 = scmp.lt.s32.totalorder %s3144_s6, %s3144_s6 }
  0x1d   : > { %p3135_p0 = pneg %p2803_p13  ;;  %p3154_p7 = por %p3153_p9, %p3152_p6 }
  0x1f   : > { %p3147_p4 = pnand %p3145_p2, %p3135_p0 }
  0x21   : > { %p3148_p5 = pneg %p3147_p4 }
  0x23   : > { %p3155_p8 = pnand %p3154_p7, %p3148_p5 }
  0x25   : > { %3158 = shalt.err (!%p3155_p8)
}
  0x26   : > { %s3314_s7 = smov 64   ;;  %s3315_s8 = smov 4  }
  0x27   : > { %s3881_s1 = sld [smem:[#allocation16_spill]]  ;;  %s29_s11 = sadd.s32 1, %s3303_s20 }
  0x28   : > { %p30_p7 = scmp.ge.s32.totalorder %s29_s11, 2  ;;  %s32_s15 = sadd.s32 1, %s3307_s21 }
  0x29   : > { %s39_s23 = sadd.s32 1, %s3291_s17  ;;  %p46_p9 = scmp.ne.s32.totalorder %s3291_s17, %s3287_s16 }
  0x2a   : > { %s3903_s11 = smov (%p30_p7, %s29_s11), 0  ;;  %s3905_s15 = smov (!%p30_p7, %s32_s15), %s3307_s21 }
  0x2b   : > { %3882 = sst [smem:[#allocation14_spill]] %s3903_s11  ;;  %p47_p10 = scmp.eq.s32.totalorder %s3311_s22, 0 }
  0x2c   : > { %s105_s24 = ssub.s32 %s3303_s20, %s3903_s11  ;;  %p34_p12 = scmp.ge.s32.totalorder %s3905_s15, 2 }
  0x2d   : > { %2805 = dma.hbm_to_vmem [thread:$0]  (!%p2803_p13), %s3881_s1, 9408, %s146_s5, [#allocation6], %s3314_s7, %s3314_s7, %s3315_s8  }
  0x2e   : > { %p2815_p0 = scmp.lt.s32.totalorder %s3311_s22, 4  ;;  %p3447_p13 = por %p47_p10, %p46_p9 }
  0x2f   : > { %s162_s5 = sand.u32 1, %s3291_s17   ;;  %s3907_s15 = smov (%p34_p12, %s3905_s15), 0 }
  0x30   : > { %3884 = sst [smem:[#allocation15_spill]] %s3907_s15  ;;  %s2791_s6 = smul.u32 576, %s162_s5 }
  0x31   : > { %s36_s7 = ssub.s32 %s3307_s21, %s3907_s15  ;;  %s2792_s8 = smul.u32 9216, %s3307_s21 }
  0x32   : > { %p37_p2 = scmp.eq.s32.totalorder %s36_s7, 0  ;;  %s106_s9 = sor.u32 %s105_s24, %s36_s7 }
  0x33   : > { %p107_p4 = scmp.eq.s32.totalorder %s106_s9, 0  ;;  %s172_s29 = scalar_lea.hbm %s3860_s0, %s2792_s8 }
  0x34   : > { %s3458_s10 = scalar_select %p37_p2, %s3291_s17, %s39_s23  }
  0x35   : > { %s3463_s1 = scalar_select %p107_p4, %s3279_s14, %s109_s26  }
  0x36   : > { %s166_s12 = scalar_lea.vmem [#allocation2], %s2791_s6  ;;  %p3472_p5 = pnand %p2815_p0, %p3447_p13 }
  0x37   : > { %s173_s3 = sshll.u32 %s166_s12, 4  ;;  %s163_s24 = scalar_lea.sflag [#allocation3], %s162_s5  ;;  %s174_s3 = int_to_ptr.vmem [resolvable:$true] %s173_s3 }
  0x38   : > { %p3161_p6 = pneg %p3472_p5  ;;  %s3172_s23 = scalar_lea.vmem %s174_s3, 9216 }
  0x39   : > { %p3173_p8 = scmp.ne.s32.totalorder %s174_s3, %s3172_s23  ;;  %s3316_s26 = smov [#allocation2]  }
  0x3a   : > { %s3177_s20 = sshll.u32 %s3316_s26, 4  ;;  %s3178_s20 = int_to_ptr.vmem [resolvable:$false] %s3177_s20 }
  0x3b   : > { %p3175_p7 = pnand %p3173_p8, %p3161_p6  ;;  %s3179_s11 = scalar_lea.vmem %s3178_s20, 18432 }
  0x3c   : > { %p3180_p10 = scmp.lt.s32.totalorder %s174_s3, %s3178_s20  ;;  %p3181_p12 = scmp.lt.s32.totalorder %s3179_s11, %s3172_s23 }
  0x3d   : > { %p3176_p9 = pneg %p3175_p7 }
  0x3e   : > { %p3182_p2 = por %p3181_p12, %p3180_p10 }
  0x40   : > { %p3183_p4 = pnand %p3182_p2, %p3176_p9 }
  0x42   : > { %3186 = shalt.err (!%p3183_p4)
}
  0x43   : > { %s3317_s12 = smov 256   ;;  %s3318_s4 = smov 16  }
  0x44   : > { %2809 = dma.hbm_to_vmem [thread:$0]  (!%p3472_p5), %s172_s29, 9216, %s174_s3, %s163_s24, %s3317_s12, %s3317_s12, %s3318_s4  }
  0x45   : > { %185 = sbr.rel (%p3424_p11) target bundleno = 520 (0x208), region = 32  ;;  %s187_s5 = sand.u32 (!%p3424_p11), 1, %s3287_s16  }
  0x46   : > { %s2793_s6 = smul.u32 (!%p3424_p11), 576, %s187_s5  ;;  %s188_s7 = scalar_lea.sflag (!%p3424_p11), [#allocation3], %s187_s5 }
  0x48   : > { %s3483_s8 = scalar_lea.vmem (!%p3424_p11), [#allocation2], %s2793_s6 }
  0x4a   : > { %3258 = dma.done.wait (%p3408_p3), %s188_s7, 9216  }
  0x4b   : > { %3260 = vsyncadd (%p3408_p3), %s188_s7, 4294958080 }
  0x4c   : > { %3262 = dma.done.wait (%p3399_p1), [#allocation6], 9408  }
  0x4d   : > { %3264 = vsyncadd (%p3399_p1), [#allocation6], 4294957888  ;;  %v3319_v0 = vmov 0   ;;  %v2914_v1 = vld [vmem:[#allocation5 + $0x13c] sm:$0xff]   ;;  %v2917_v4 = vld [vmem:[#allocation5 + $0x134] sm:$0xff]   ;;  %s3497_s3 = sshll.u32 %s3295_s18, 7 }
  0x4e   : > { %820 = vmatprep.subr.bf16.mxu1 %v3319_v0  ;;  %v2915_v2 = vld [vmem:[#allocation5 + $0x17c] sm:$0xff]   ;;  %2599 = vmatprep.subr.bf16.mxu0 %v2914_v1  ;;  %v2918_v5 = vld [vmem:[#allocation5 + $0x174] sm:$0xff]   ;;  %v2920_v7 = vld [vmem:[#allocation5 + $0x12c] sm:$0xff]   ;;  %s307_s25 = sadd.s32 16, %s3497_s3  ;;  %vm719_vm0 = vcmask 1042432   ;;  %vm694_vm1 = vcmask 48128  }
  0x4f   : > { %v2916_v3 = vld [vmem:[#allocation5 + $0xfc] sm:$0xff]   ;;  %821 = vmatpush1.bf16.msra.mxu1 %v2915_v2  ;;  %v2919_v6 = vld [vmem:[#allocation5 + $0xf4] sm:$0xff]   ;;  %v2921_v8 = vld [vmem:[#allocation5 + $0x16c] sm:$0xff]   ;;  %s308_s27 = sshra.s32 %s307_s25, 3  ;;  %s221_s15 = sshra.s32 %s3497_s3, 3 }
  0x50   : > { %2600 = vmatpush3.bf16.msra.mxu0 %v2916_v3  ;;  %822 = vmatprep.subr.bf16.mxu1 %v3319_v0  ;;  %v2922_v9 = vld [vmem:[#allocation5 + $0xec] sm:$0xff]   ;;  %v2923_v10 = vld [vmem:[#allocation5 + $0x124] sm:$0xff]   ;;  %v2926_v13 = vld [vmem:[#allocation5 + $0x11c] sm:$0xff]   ;;  %s2534_s29 = sshll.u32 %s308_s27, 4  ;;  %s2533_s9 = sshll.u32 %s221_s15, 4 }
  0x51   : > { %2601 = vmatprep.subr.bf16.mxu0 %v2917_v4  ;;  %v2924_v11 = vld [vmem:[#allocation5 + $0x164] sm:$0xff]   ;;  %v2927_v14 = vld [vmem:[#allocation5 + $0x15c] sm:$0xff]   ;;  %v2929_v16 = vld [vmem:[#allocation5 + $0x114] sm:$0xff]   ;;  %s3504_s30 = scalar_lea.vmem %s3483_s8, %s2534_s29 [#allocation2]  ;;  %s3548_s24 = scalar_lea.vmem %s3483_s8, %s2533_s9 [#allocation2] }
  0x52   : > { %v2925_v12 = vld [vmem:[#allocation5 + $0xe4] sm:$0xff]   ;;  %v2928_v15 = vld [vmem:[#allocation5 + $0xdc] sm:$0xff]   ;;  %v2930_v17 = vld [vmem:[#allocation5 + $0x154] sm:$0xff]   ;;  %s1437_s23 = sadd.s32 32, %s3497_s3  ;;  %s215_s5 = sand.u32 1, %s3275_s13  }
  0x53   : > { %823 = vmatpush1.bf16.msra.mxu1 %v2918_v5  ;;  %v2931_v18 = vld [vmem:[#allocation5 + $0xd4] sm:$0xff]   ;;  %v2932_v19 = vld [vmem:[#allocation5 + $0x10c] sm:$0xff]   ;;  %v2935_v22 = vld [vmem:[#allocation5 + $0x104] sm:$0xff]   ;;  %s1438_s26 = sshra.s32 %s1437_s23, 3  ;;  %s2307_s6 = sshll.u32 %s215_s5, 6 }
  0x54   : > { %2602 = vmatpush3.bf16.msra.mxu0 %v2919_v6  ;;  %824 = vmatprep.subr.bf16.mxu1 %v3319_v0  ;;  %v2933_v20 = vld [vmem:[#allocation5 + $0x14c] sm:$0xff]   ;;  %v2940_v23 = vld [vmem:[%s3504_s30 + $0x4] ss:$16 sps:$4 sm:$0xff]   ;;  %v2942_v27 = vld [vmem:[#allocation5 + $0x78] sm:$0xff]   ;;  %s2535_s20 = sshll.u32 %s1438_s26, 4  ;;  %s3751_s7 = scalar_lea.vmem [#allocation7], %s2307_s6 }
  0x55   : > { %2603 = vmatprep.subr.bf16.mxu0 %v2920_v7  ;;  %v2934_v21 = vld [vmem:[#allocation5 + $0xcc] sm:$0xff]   ;;  %v2936_v24 = vld [vmem:[#allocation5 + $0x144] sm:$0xff]   ;;  %755 = vmatprep.mubr.bf16.mxu0 %v2940_v23  ;;  %v2943_v31 = vld [vmem:[#allocation5 + $0x38] sm:$0xff]   ;;  %s3587_s11 = scalar_lea.vmem %s3483_s8, %s2535_s20 [#allocation2]  ;;  %s2528_s8 = sshll.u32 %s3295_s18, 4 }
  0x56   : > { %v2941_v25 = vld [vmem:[#allocation5 + $0x184] ss:$0 sps:$4 sm:$0x77]   ;;  %v2946_v28 = vld [vmem:[%s3504_s30 + $0xc] ss:$16 sps:$4 sm:$0xff]   ;;  %v2951_v33 = vld [vmem:[#allocation5 + $0x70] sm:$0xff]  }
  0x57   : > { %825 = vmatpush1.bf16.msra.mxu1 %v2921_v8  ;;  %v2937_v26 = vld [vmem:[#allocation5 + $0xc4] sm:$0xff]   ;;  %v2938_v29 = vld [vmem:[%s3504_s30] ss:$16 sps:$4 sm:$0xff]   ;;  %v721_v30 = vsel %vm719_vm0, %v2941_v25, 0  ;;  %2370 = vmatprep.mubr.msk.bf16.mxu1 %vm694_vm1, %v2946_v28  ;;  %v2947_v35 = vld [vmem:[#allocation5 + $0xb8] sm:$0xff]   ;;  %s2529_s3 = sshll.u32 %s3299_s19, 5 }
  0x58   : > { %2604 = vmatpush3.bf16.msra.mxu0 %v2922_v9  ;;  %826 = vmatprep.subr.bf16.mxu1 %v3319_v0  ;;  %v2948_v32 = vld [vmem:[%s3504_s30 + $0x24] ss:$16 sps:$4 sm:$0xff]   ;;  %v2944_v34 = vld [vmem:[%s3504_s30 + $0x8] ss:$16 sps:$4 sm:$0xff]   ;;  %v2953_v36 = vld [vmem:[%s3504_s30 + $0x2c] ss:$16 sps:$4 sm:$0xff]   ;;  %s2193_s25 = sadd.s32 %s2529_s3, %s2528_s8 }
  0x59   : > { %2605 = vmatprep.subr.bf16.mxu0 %v2923_v10  ;;  %v2952_v37 = vld [vmem:[#allocation5 + $0x30] sm:$0xff]   ;;  %v2960_v39 = vld [vmem:[#allocation5 + $0x68] sm:$0xff]   ;;  %v2969_v46 = vld [vmem:[#allocation5 + $0x60] sm:$0xff]   ;;  %s2530_s27 = sshll.u32 %s2193_s25, 6  ;;  %s2196_s29 = sshll.u32 %s3751_s7, 4  ;;  %s3795_s29 = int_to_ptr.vmem [resolvable:$true] %s2196_s29 }
  0x5a   : > { %v2950_v38 = vld [vmem:[%s3504_s30 + $0x20] ss:$16 sps:$4 sm:$0xff]   ;;  %v2957_v41 = vld [vmem:[%s3504_s30 + $0x44] ss:$16 sps:$4 sm:$0xff]   ;;  %v2961_v42 = vld [vmem:[#allocation5 + $0x28] sm:$0xff]   ;;  %s3800_s9 = scalar_lea.sflag [#allocation4], %s215_s5 }
  0x5b   : > { %827 = vmatpush1.bf16.msra.mxu1 %v2924_v11  ;;  %v2956_v40 = vld [vmem:[#allocation5 + $0xb0] sm:$0xff]   ;;  %v2955_v43 = vld [vmem:[%s3504_s30 + $0x28] ss:$16 sps:$4 sm:$0xff]   ;;  %v2962_v44 = vld [vmem:[%s3504_s30 + $0x4c] ss:$16 sps:$4 sm:$0xff]   ;;  %p3887_p3 = scmp.ne.s32.totalorder %s3877_s28, 0 }
  0x5c   : > { %2606 = vmatpush3.bf16.msra.mxu0 %v2925_v12  ;;  %828 = vmatprep.subr.bf16.mxu1 %v3319_v0  ;;  %v2965_v45 = vld [vmem:[#allocation5 + $0xa8] sm:$0xff]   ;;  %v2970_v47 = vld [vmem:[#allocation5 + $0x20] sm:$0xff]   ;;  %v2978_v52 = vld [vmem:[#allocation5 + $0x58] sm:$0xff]   ;;  %s3320_s23 = smov [#allocation7]  }
  0x5d   : > { %2607 = vmatprep.subr.bf16.mxu0 %v2926_v13  ;;  %v2959_v48 = vld [vmem:[%s3504_s30 + $0x40] ss:$16 sps:$4 sm:$0xff]   ;;  %v2964_v50 = vld [vmem:[%s3504_s30 + $0x48] ss:$16 sps:$4 sm:$0xff]   ;;  %v2966_v51 = vld [vmem:[%s3504_s30 + $0x64] ss:$16 sps:$4 sm:$0xff]  }
  0x5e   : > { %v2974_v49 = vld [vmem:[#allocation5 + $0xa0] sm:$0xff]   ;;  %v2979_v53 = vld [vmem:[#allocation5 + $0x18] sm:$0xff]   ;;  %v2987_v58 = vld [vmem:[#allocation5 + $0x50] sm:$0xff]   ;;  %s3191_s26 = sshll.u32 %s3320_s23, 4  ;;  %s3192_s26 = int_to_ptr.vmem [resolvable:$false] %s3191_s26 }
  0x5f   : > { %829 = vmatpush1.bf16.msra.mxu1 %v2927_v14  ;;  %v2971_v54 = vld [vmem:[%s3504_s30 + $0x6c] ss:$16 sps:$4 sm:$0xff]   ;;  %v2968_v56 = vld [vmem:[%s3504_s30 + $0x60] ss:$16 sps:$4 sm:$0xff]   ;;  %v2975_v57 = vld [vmem:[%s3504_s30 + $0x84] ss:$16 sps:$4 sm:$0xff]   ;;  %p3194_p13 = scmp.lt.s32.totalorder %s3795_s29, %s3192_s26 }
  0x60   : > { %2608 = vmatpush3.bf16.msra.mxu0 %v2928_v15  ;;  %830 = vmatprep.subr.bf16.mxu1 %v3319_v0  ;;  %v2982_v55 = vld [vmem:[#allocation5 + $0x98] sm:$0xff]   ;;  %v2988_v59 = vld [vmem:[#allocation5 + $0x10] sm:$0xff]   ;;  %v2996_v63 = vld [vmem:[#allocation5 + $0x48] sm:$0xff]   ;;  %s3193_s20 = scalar_lea.vmem %s3192_s26, 2048 }
  0x61   : > { %2609 = vmatprep.subr.bf16.mxu0 %v2929_v16  ;;  %v2989_v60 = vld [vmem:[#allocation5 + $0x90] sm:$0xff]   ;;  %v2973_v61 = vld [vmem:[%s3504_s30 + $0x68] ss:$16 sps:$4 sm:$0xff]   ;;  %v2980_v62 = vld [vmem:[%s3504_s30 + $0x8c] ss:$16 sps:$4 sm:$0xff]  }
  0x62   : > { %v2997_v1 = vld [vmem:[#allocation5 + $0x88] sm:$0xff]   ;;  %v2977_v3 = vld [vmem:[%s3504_s30 + $0x80] ss:$16 sps:$4 sm:$0xff]   ;;  %v2984_v4 = vld [vmem:[%s3504_s30 + $0xa4] ss:$16 sps:$4 sm:$0xff]  }
  0x63   : > { %831 = vmatpush1.bf16.msra.mxu1 %v2930_v17  ;;  %v2998_v2 = vld [vmem:[#allocation5 + $0x8] sm:$0xff]   ;;  %v3004_v7 = vld [vmem:[#allocation5 + $0x80] sm:$0xff]   ;;  %v3024_v28 = vld [vmem:[#allocation5 + $0x1f8] sm:$0xff]  }
  0x64   : > { %2610 = vmatpush3.bf16.msra.mxu0 %v2931_v18  ;;  %832 = vmatprep.subr.bf16.mxu1 %v3319_v0  ;;  %v2983_v5 = vld [vmem:[%s3504_s30 + $0x88] ss:$16 sps:$4 sm:$0xff]   ;;  %v2990_v6 = vld [vmem:[%s3504_s30 + $0xac] ss:$16 sps:$4 sm:$0xff]   ;;  %v3006_v8 = vld [vmem:[#allocation5 + $0x40] sm:$0xff]  }
  0x65   : > { %2611 = vmatprep.subr.bf16.mxu0 %v2932_v19  ;;  %v3007_v9 = vld [vmem:[#allocation5] sm:$0xff]   ;;  %v2992_v15 = vld [vmem:[%s3504_s30 + $0xa8] ss:$16 sps:$4 sm:$0xff]   ;;  %v2999_v16 = vld [vmem:[%s3504_s30 + $0xcc] ss:$16 sps:$4 sm:$0xff]  }
  0x66   : > { %v3011_v10 = vld [vmem:[#allocation5 + $0xc0] ss:$0 sps:$4 sm:$0x77]   ;;  %v2993_v12 = vld [vmem:[%s3504_s30 + $0xc4] ss:$16 sps:$4 sm:$0xff]  }
  0x67   : > { %833 = vmatpush1.bf16.msra.mxu1 %v2933_v20  ;;  %v2986_v11 = vld [vmem:[%s3504_s30 + $0xa0] ss:$16 sps:$4 sm:$0xff]   ;;  %v1241_v13 = vsel %vm719_vm0, %v3011_v10, 0  ;;  %v3002_v18 = vld [vmem:[%s3504_s30 + $0xe4] ss:$16 sps:$4 sm:$0xff]  }
  0x68   : > { %2612 = vmatpush3.bf16.msra.mxu0 %v2934_v21  ;;  %834 = vmatprep.subr.bf16.mxu1 %v3319_v0  ;;  %v3015_v14 = vld [vmem:[#allocation5 + $0x200] sm:$0xff]   ;;  %v3001_v19 = vld [vmem:[%s3504_s30 + $0xc8] ss:$16 sps:$4 sm:$0xff]   ;;  %v3008_v20 = vld [vmem:[%s3504_s30 + $0xec] ss:$16 sps:$4 sm:$0xff]  }
  0x69   : > { %2613 = vmatprep.subr.bf16.mxu0 %v2935_v22  ;;  %v2995_v17 = vld [vmem:[%s3504_s30 + $0xc0] ss:$16 sps:$4 sm:$0xff]   ;;  %v3014_v22 = vld [vmem:[%s3548_s24 + $0x4] ss:$16 sps:$4 sm:$0xff]   ;;  %v3010_v23 = vld [vmem:[%s3504_s30 + $0xe8] ss:$16 sps:$4 sm:$0xff]  }
  0x6a   : > { %v3005_v21 = vld [vmem:[%s3504_s30 + $0xe0] ss:$16 sps:$4 sm:$0xff]   ;;  %v3072_v10 = vld [vmem:[%s3548_s24 + $0xcc] ss:$16 sps:$4 sm:$0xff]   ;;  %s3886_s30 = sld [smem:[#allocation17_spill]] }
  0x6b   : > { %835 = vmatpush1.bf16.msra.mxu1 %v2936_v24  ;;  %v3019_v24 = vld [vmem:[%s3548_s24 + $0xc] ss:$16 sps:$4 sm:$0xff]   ;;  %v3012_v25 = vld [vmem:[%s3548_s24] ss:$16 sps:$4 sm:$0xff]  }
  0x6c   : > { %2614 = vmatpush3.bf16.msra.mxu0 %v2937_v26  ;;  %850 = vmatprep.subr.bf16.mxu1 %v3319_v0  ;;  %v3016_v26 = vld [vmem:[#allocation5 + $0x1c0] sm:$0xff]  }
  0x6d   : > { %2663 = vmatprep.subr.bf16.mxu0 %v2942_v27  ;;  %v3021_v27 = vld [vmem:[%s3548_s24 + $0x24] ss:$16 sps:$4 sm:$0xff]  }
  0x6f   : > { %756 = vmatmul.mubr.bf16.vlgmr.msra.gmra.mxu0 %v2938_v29  ;;  %851 = vmatpush2.bf16.msra.mxu1 %v721_v30  ;;  %v3017_v29 = vld [vmem:[%s3548_s24 + $0x8] ss:$16 sps:$4 sm:$0xff]   ;;  %v3020_v30 = vld [vmem:[#allocation5 + $0x240] sm:$0xff]  }
  0x70   : > { %2664 = vmatpush3.bf16.msra.mxu0 %v2943_v31  ;;  %1340 = vmatprep.subr.bf16.mxu1 %v3319_v0  ;;  %v3026_v31 = vld [vmem:[%s3548_s24 + $0x2c] ss:$16 sps:$4 sm:$0xff]   ;;  %s3793_s15 = scalar_lea.hbm %s3886_s30, %s2530_s27 }
  0x71   : > { %763 = vmatprep.mubr.bf16.mxu0 %v2948_v32  ;;  %2665 = vmatprep.subr.bf16.mxu0 %v2951_v33  ;;  %v3025_v32 = vld [vmem:[#allocation5 + $0x1b8] sm:$0xff]   ;;  %v3033_v33 = vld [vmem:[#allocation5 + $0x1f0] sm:$0xff]  }
  0x72   : > { %853 = vmatmul.mubr.bf16.vlgmr.msra.gmra.mxu1 %v2944_v34  ;;  %v3023_v34 = vld [vmem:[%s3548_s24 + $0x20] ss:$16 sps:$4 sm:$0xff]  }
  0x73   : > { %1341 = vmatpush1.bf16.msra.mxu1 %v2947_v35  ;;  %2371 = vmatprep.mubr.msk.bf16.mxu1 %vm694_vm1, %v2953_v36  ;;  %v3029_v35 = vld [vmem:[#allocation5 + $0x238] sm:$0xff]   ;;  %v3030_v36 = vld [vmem:[%s3548_s24 + $0x44] ss:$16 sps:$4 sm:$0xff]  }
  0x74   : > { %2666 = vmatpush3.bf16.msra.mxu0 %v2952_v37  ;;  %1342 = vmatprep.subr.bf16.mxu1 %v3319_v0  ;;  %v3034_v37 = vld [vmem:[#allocation5 + $0x1b0] sm:$0xff]  }
  0x75   : > { %2667 = vmatprep.subr.bf16.mxu0 %v2960_v39  ;;  %v3042_v39 = vld [vmem:[#allocation5 + $0x1e8] sm:$0xff]  }
  0x77   : > { %764 = vmatmul.mubr.bf16.gmra.mxu0 %v2950_v38  ;;  %1343 = vmatpush1.bf16.msra.mxu1 %v2956_v40  ;;  %v3028_v38 = vld [vmem:[%s3548_s24 + $0x28] ss:$16 sps:$4 sm:$0xff]   ;;  %v3035_v40 = vld [vmem:[%s3548_s24 + $0x4c] ss:$16 sps:$4 sm:$0xff]  }
  0x78   : > { %771 = vmatprep.mubr.bf16.mxu0 %v2957_v41  ;;  %2668 = vmatpush3.bf16.msra.mxu0 %v2961_v42  ;;  %v3038_v41 = vld [vmem:[#allocation5 + $0x230] sm:$0xff]   ;;  %v3043_v42 = vld [vmem:[#allocation5 + $0x1a8] sm:$0xff]  }
  0x79   : > { %1344 = vmatprep.subr.bf16.mxu1 %v3319_v0  ;;  %2669 = vmatprep.subr.bf16.mxu0 %v2969_v46  ;;  %v3039_v46 = vld [vmem:[%s3548_s24 + $0x64] ss:$16 sps:$4 sm:$0xff]  }
  0x7a   : > { %861 = vmatmul.mubr.bf16.gmra.mxu1 %v2955_v43  ;;  %v3051_v43 = vld [vmem:[#allocation5 + $0x1e0] sm:$0xff]  }
  0x7b   : > { %2372 = vmatprep.mubr.msk.bf16.mxu1 %vm694_vm1, %v2962_v44  ;;  %1345 = vmatpush1.bf16.msra.mxu1 %v2965_v45  ;;  %v3032_v44 = vld [vmem:[%s3548_s24 + $0x40] ss:$16 sps:$4 sm:$0xff]   ;;  %v3047_v45 = vld [vmem:[#allocation5 + $0x228] sm:$0xff]  }
  0x7c   : > { %2670 = vmatpush3.bf16.msra.mxu0 %v2970_v47  ;;  %1346 = vmatprep.subr.bf16.mxu1 %v3319_v0  ;;  %v3052_v47 = vld [vmem:[#allocation5 + $0x1a0] sm:$0xff]  }
  0x7d   : > { %2671 = vmatprep.subr.bf16.mxu0 %v2978_v52  ;;  %v3061_v52 = vld [vmem:[#allocation5 + $0x198] sm:$0xff]  }
  0x7f   : > { %772 = vmatmul.mubr.bf16.gmra.mxu0 %v2959_v48  ;;  %1347 = vmatpush1.bf16.msra.mxu1 %v2974_v49  ;;  %v3060_v48 = vld [vmem:[#allocation5 + $0x1d8] sm:$0xff]  }
  0x80   : > { %779 = vmatprep.mubr.bf16.mxu0 %v2966_v51  ;;  %2672 = vmatpush3.bf16.msra.mxu0 %v2979_v53  ;;  %v3037_v49 = vld [vmem:[%s3548_s24 + $0x48] ss:$16 sps:$4 sm:$0xff]   ;;  %v3055_v51 = vld [vmem:[#allocation5 + $0x220] sm:$0xff]   ;;  %v3069_v53 = vld [vmem:[#allocation5 + $0x1d0] sm:$0xff]  }
  0x81   : > { %1348 = vmatprep.subr.bf16.mxu1 %v3319_v0  ;;  %2673 = vmatprep.subr.bf16.mxu0 %v2987_v58  ;;  %v3053_v58 = vld [vmem:[%s3548_s24 + $0x8c] ss:$16 sps:$4 sm:$0xff]  }
  0x82   : > { %869 = vmatmul.mubr.bf16.gmra.mxu1 %v2964_v50  ;;  %v3044_v50 = vld [vmem:[%s3548_s24 + $0x6c] ss:$16 sps:$4 sm:$0xff]  }
  0x83   : > { %2373 = vmatprep.mubr.msk.bf16.mxu1 %vm694_vm1, %v2971_v54  ;;  %1349 = vmatpush1.bf16.msra.mxu1 %v2982_v55  ;;  %v3041_v54 = vld [vmem:[%s3548_s24 + $0x60] ss:$16 sps:$4 sm:$0xff]   ;;  %v3062_v55 = vld [vmem:[#allocation5 + $0x218] sm:$0xff]  }
  0x84   : > { %1350 = vmatprep.subr.bf16.mxu1 %v3319_v0  ;;  %2674 = vmatpush3.bf16.msra.mxu0 %v2988_v59  ;;  %v3071_v59 = vld [vmem:[#allocation5 + $0x190] sm:$0xff]  }
  0x85   : > { %2675 = vmatprep.subr.bf16.mxu0 %v2996_v63  ;;  %v3050_v63 = vld [vmem:[%s3548_s24 + $0x80] ss:$16 sps:$4 sm:$0xff]  }
  0x87   : > { %780 = vmatmul.mubr.bf16.gmra.mxu0 %v2968_v56  ;;  %1351 = vmatpush1.bf16.msra.mxu1 %v2989_v60  ;;  %v3046_v56 = vld [vmem:[%s3548_s24 + $0x68] ss:$16 sps:$4 sm:$0xff]  }
  0x88   : > { %787 = vmatprep.mubr.bf16.mxu0 %v2975_v57  ;;  %1352 = vmatprep.subr.bf16.mxu1 %v3319_v0  ;;  %v3048_v57 = vld [vmem:[%s3548_s24 + $0x84] ss:$16 sps:$4 sm:$0xff]   ;;  %v3079_v60 = vld [vmem:[#allocation5 + $0x1c8] sm:$0xff]  }
  0x89   : > { %2676 = vmatpush3.bf16.msra.mxu0 %v2998_v2  ;;  %v3057_v2 = vld [vmem:[%s3548_s24 + $0xa4] ss:$16 sps:$4 sm:$0xff]  }
  0x8a   : > { %877 = vmatmul.mubr.bf16.gmra.mxu1 %v2973_v61  ;;  %2677 = vmatprep.subr.bf16.mxu0 %v3006_v8  ;;  %v3070_v61 = vld [vmem:[#allocation5 + $0x210] sm:$0xff]  }
  0x8b   : > { %2374 = vmatprep.mubr.msk.bf16.mxu1 %vm694_vm1, %v2980_v62  ;;  %1353 = vmatpush1.bf16.msra.mxu1 %v2997_v1  ;;  %v3080_v62 = vld [vmem:[#allocation5 + $0x188] sm:$0xff]   ;;  %v3066_v8 = vld [vmem:[%s3548_s24 + $0xc4] ss:$16 sps:$4 sm:$0xff]  }
  0x8c   : > { %1354 = vmatprep.subr.bf16.mxu1 %v3319_v0  ;;  %v3077_v1 = vld [vmem:[#allocation5 + $0x208] sm:$0xff]  }
  0x8d   : > { %2678 = vmatpush3.bf16.msra.mxu0 %v3007_v9  ;;  %v3065_v9 = vld [vmem:[%s3548_s24 + $0xa8] ss:$16 sps:$4 sm:$0xff]  }
  0x8e   : > { %2727 = vmatprep.subr.bf16.mxu0 %v3015_v14  ;;  %v3078_v14 = vld [vmem:[%s3548_s24 + $0xe0] ss:$16 sps:$4 sm:$0xff]  }
  0x8f   : > { %788 = vmatmul.mubr.bf16.gmra.mxu0 %v2977_v3  ;;  %1355 = vmatpush1.bf16.msra.mxu1 %v3004_v7  ;;  %v3084_v3 = vld [vmem:[#allocation5 + $0x248] ss:$0 sps:$4 sm:$0x77]   ;;  %v3059_v7 = vld [vmem:[%s3548_s24 + $0xa0] ss:$16 sps:$4 sm:$0xff]  }
  0x90   : > { %795 = vmatprep.mubr.bf16.mxu0 %v2984_v4  ;;  %1370 = vmatprep.subr.bf16.mxu1 %v3319_v0  ;;  %v3056_v4 = vld [vmem:[%s3548_s24 + $0x88] ss:$16 sps:$4 sm:$0xff]  }
  0x92   : > { %885 = vmatmul.mubr.bf16.gmra.mxu1 %v2983_v5  ;;  %v3063_v5 = vld [vmem:[%s3548_s24 + $0xac] ss:$16 sps:$4 sm:$0xff]  }
  0x93   : > { %2375 = vmatprep.mubr.msk.bf16.mxu1 %vm694_vm1, %v2990_v6  ;;  %1371 = vmatpush2.bf16.msra.mxu1 %v1241_v13  ;;  %v1849_v6 = vsel %vm719_vm0, %v3084_v3, 0  ;;  %v3081_v13 = vld [vmem:[%s3548_s24 + $0xec] ss:$16 sps:$4 sm:$0xff]  }
  0x94   : > { %1948 = vmatprep.subr.bf16.mxu1 %v3319_v0 }
  0x97   : > { %796 = vmatmul.mubr.bf16.gmra.mxu0 %v2986_v11  ;;  %v3068_v11 = vld [vmem:[%s3548_s24 + $0xc0] ss:$16 sps:$4 sm:$0xff]  }
  0x98   : > { %803 = vmatprep.mubr.bf16.mxu0 %v2993_v12  ;;  %v3074_v12 = vld [vmem:[%s3548_s24 + $0xc8] ss:$16 sps:$4 sm:$0xff]  }
  0x9a   : > { %893 = vmatmul.mubr.bf16.gmra.mxu1 %v2992_v15  ;;  %v3087_v15 = vld [vmem:[%s3587_s11 + $0x4] ss:$16 sps:$4 sm:$0xff]  }
  0x9b   : > { %2376 = vmatprep.mubr.msk.bf16.mxu1 %vm694_vm1, %v2999_v16  ;;  %v3083_v16 = vld [vmem:[%s3548_s24 + $0xe8] ss:$16 sps:$4 sm:$0xff]  }
  0x9f   : > { %804 = vmatmul.mubr.bf16.gmra.mxu0 %v2995_v17  ;;  %v3090_v17 = vld [vmem:[%s3587_s11 + $0xc] ss:$16 sps:$4 sm:$0xff]  }
  0xa0   : > { %811 = vmatprep.mubr.bf16.mxu0 %v3002_v18  ;;  %v3085_v18 = vld [vmem:[%s3587_s11] ss:$16 sps:$4 sm:$0xff]  }
  0xa2   : > { %901 = vmatmul.mubr.bf16.gmra.mxu1 %v3001_v19  ;;  %v3091_v19 = vld [vmem:[%s3587_s11 + $0x24] ss:$16 sps:$4 sm:$0xff]  }
  0xa3   : > { %2377 = vmatprep.mubr.msk.bf16.mxu1 %vm694_vm1, %v3008_v20  ;;  %v3088_v20 = vld [vmem:[%s3587_s11 + $0x8] ss:$16 sps:$4 sm:$0xff]  }
  0xa7   : > { %812 = vmatmul.mubr.bf16.gmra.mxu0 %v3005_v21  ;;  %v3094_v21 = vld [vmem:[%s3587_s11 + $0x2c] ss:$16 sps:$4 sm:$0xff]  }
  0xa8   : > { %1275 = vmatprep.mubr.bf16.mxu0 %v3014_v22  ;;  %v3093_v22 = vld [vmem:[%s3587_s11 + $0x20] ss:$16 sps:$4 sm:$0xff]  }
  0xaa   : > { %909 = vmatmul.mubr.bf16.gmra.mxu1 %v3010_v23  ;;  %v3097_v23 = vld [vmem:[%s3587_s11 + $0x44] ss:$16 sps:$4 sm:$0xff]  }
  0xab   : > { %2435 = vmatprep.mubr.msk.bf16.mxu1 %vm694_vm1, %v3019_v24  ;;  %v3096_v24 = vld [vmem:[%s3587_s11 + $0x28] ss:$16 sps:$4 sm:$0xff]  }
  0xaf   : > { %1276 = vmatmul.mubr.bf16.vlgmr.msra.gmra.mxu0 %v3012_v25  ;;  %v3100_v25 = vld [vmem:[%s3587_s11 + $0x4c] ss:$16 sps:$4 sm:$0xff]  }
  0xb0   : > { %2728 = vmatpush3.bf16.msra.mxu0 %v3016_v26  ;;  %1283 = vmatprep.mubr.bf16.mxu0 %v3021_v27  ;;  %v3099_v26 = vld [vmem:[%s3587_s11 + $0x40] ss:$16 sps:$4 sm:$0xff]   ;;  %v3103_v27 = vld [vmem:[%s3587_s11 + $0x64] ss:$16 sps:$4 sm:$0xff]  }
  0xb1   : > { %2729 = vmatprep.subr.bf16.mxu0 %v3024_v28  ;;  %v3102_v28 = vld [vmem:[%s3587_s11 + $0x48] ss:$16 sps:$4 sm:$0xff]  }
  0xb2   : > { %1373 = vmatmul.mubr.bf16.vlgmr.msra.gmra.mxu1 %v3017_v29  ;;  %v3106_v29 = vld [vmem:[%s3587_s11 + $0x6c] ss:$16 sps:$4 sm:$0xff]  }
  0xb3   : > { %1949 = vmatpush1.bf16.msra.mxu1 %v3020_v30  ;;  %2436 = vmatprep.mubr.msk.bf16.mxu1 %vm694_vm1, %v3026_v31  ;;  %v3105_v30 = vld [vmem:[%s3587_s11 + $0x60] ss:$16 sps:$4 sm:$0xff]   ;;  %v3109_v31 = vld [vmem:[%s3587_s11 + $0x84] ss:$16 sps:$4 sm:$0xff]  }
  0xb4   : > { %2730 = vmatpush3.bf16.msra.mxu0 %v3025_v32  ;;  %1950 = vmatprep.subr.bf16.mxu1 %v3319_v0  ;;  %v3108_v32 = vld [vmem:[%s3587_s11 + $0x68] ss:$16 sps:$4 sm:$0xff]  }
  0xb5   : > { %2731 = vmatprep.subr.bf16.mxu0 %v3033_v33  ;;  %v3112_v33 = vld [vmem:[%s3587_s11 + $0x8c] ss:$16 sps:$4 sm:$0xff]  }
  0xb7   : > { %1284 = vmatmul.mubr.bf16.gmra.mxu0 %v3023_v34  ;;  %1951 = vmatpush1.bf16.msra.mxu1 %v3029_v35  ;;  %v3111_v34 = vld [vmem:[%s3587_s11 + $0x80] ss:$16 sps:$4 sm:$0xff]   ;;  %v3115_v35 = vld [vmem:[%s3587_s11 + $0xa4] ss:$16 sps:$4 sm:$0xff]  }
  0xb8   : > { %1291 = vmatprep.mubr.bf16.mxu0 %v3030_v36  ;;  %2732 = vmatpush3.bf16.msra.mxu0 %v3034_v37  ;;  %v3114_v36 = vld [vmem:[%s3587_s11 + $0x88] ss:$16 sps:$4 sm:$0xff]   ;;  %v3118_v37 = vld [vmem:[%s3587_s11 + $0xac] ss:$16 sps:$4 sm:$0xff]  }
  0xb9   : > { %1952 = vmatprep.subr.bf16.mxu1 %v3319_v0  ;;  %2733 = vmatprep.subr.bf16.mxu0 %v3042_v39  ;;  %v3121_v39 = vld [vmem:[%s3587_s11 + $0xc4] ss:$16 sps:$4 sm:$0xff]  }
  0xba   : > { %1381 = vmatmul.mubr.bf16.gmra.mxu1 %v3028_v38  ;;  %v3117_v38 = vld [vmem:[%s3587_s11 + $0xa0] ss:$16 sps:$4 sm:$0xff]  }
  0xbb   : > { %2437 = vmatprep.mubr.msk.bf16.mxu1 %vm694_vm1, %v3035_v40  ;;  %1953 = vmatpush1.bf16.msra.mxu1 %v3038_v41  ;;  %v3120_v40 = vld [vmem:[%s3587_s11 + $0xa8] ss:$16 sps:$4 sm:$0xff]   ;;  %v3124_v41 = vld [vmem:[%s3587_s11 + $0xcc] ss:$16 sps:$4 sm:$0xff]  }
  0xbc   : > { %2734 = vmatpush3.bf16.msra.mxu0 %v3043_v42  ;;  %1954 = vmatprep.subr.bf16.mxu1 %v3319_v0  ;;  %v3123_v42 = vld [vmem:[%s3587_s11 + $0xc0] ss:$16 sps:$4 sm:$0xff]  }
  0xbd   : > { %2735 = vmatprep.subr.bf16.mxu0 %v3051_v43  ;;  %v3127_v43 = vld [vmem:[%s3587_s11 + $0xe4] ss:$16 sps:$4 sm:$0xff]  }
  0xbf   : > { %1292 = vmatmul.mubr.bf16.gmra.mxu0 %v3032_v44  ;;  %1955 = vmatpush1.bf16.msra.mxu1 %v3047_v45  ;;  %v3126_v44 = vld [vmem:[%s3587_s11 + $0xc8] ss:$16 sps:$4 sm:$0xff]   ;;  %v3130_v45 = vld [vmem:[%s3587_s11 + $0xec] ss:$16 sps:$4 sm:$0xff]  }
  0xc0   : > { %1299 = vmatprep.mubr.bf16.mxu0 %v3039_v46  ;;  %2736 = vmatpush3.bf16.msra.mxu0 %v3052_v47  ;;  %v3129_v46 = vld [vmem:[%s3587_s11 + $0xe0] ss:$16 sps:$4 sm:$0xff]   ;;  %v3132_v47 = vld [vmem:[%s3587_s11 + $0xe8] ss:$16 sps:$4 sm:$0xff]  }
  0xc1   : > { %1956 = vmatprep.subr.bf16.mxu1 %v3319_v0  ;;  %2737 = vmatprep.subr.bf16.mxu0 %v3060_v48 }
  0xc2   : > { %1389 = vmatmul.mubr.bf16.gmra.mxu1 %v3037_v49 }
  0xc3   : > { %2438 = vmatprep.mubr.msk.bf16.mxu1 %vm694_vm1, %v3044_v50  ;;  %1957 = vmatpush1.bf16.msra.mxu1 %v3055_v51 }
  0xc4   : > { %1958 = vmatprep.subr.bf16.mxu1 %v3319_v0  ;;  %2738 = vmatpush3.bf16.msra.mxu0 %v3061_v52 }
  0xc5   : > { %2739 = vmatprep.subr.bf16.mxu0 %v3069_v53 }
  0xc7   : > { %1300 = vmatmul.mubr.bf16.gmra.mxu0 %v3041_v54  ;;  %1959 = vmatpush1.bf16.msra.mxu1 %v3062_v55 }
  0xc8   : > { %1307 = vmatprep.mubr.bf16.mxu0 %v3048_v57  ;;  %1960 = vmatprep.subr.bf16.mxu1 %v3319_v0 }
  0xc9   : > { %2740 = vmatpush3.bf16.msra.mxu0 %v3071_v59 }
  0xca   : > { %1397 = vmatmul.mubr.bf16.gmra.mxu1 %v3046_v56  ;;  %2741 = vmatprep.subr.bf16.mxu0 %v3079_v60 }
  0xcb   : > { %2439 = vmatprep.mubr.msk.bf16.mxu1 %vm694_vm1, %v3053_v58  ;;  %1961 = vmatpush1.bf16.msra.mxu1 %v3070_v61 }
  0xcc   : > { %1962 = vmatprep.subr.bf16.mxu1 %v3319_v0 }
  0xcd   : > { %2742 = vmatpush3.bf16.msra.mxu0 %v3080_v62 }
  0xcf   : > { %1308 = vmatmul.mubr.bf16.gmra.mxu0 %v3050_v63  ;;  %1963 = vmatpush1.bf16.msra.mxu1 %v3077_v1 }
  0xd0   : > { %1315 = vmatprep.mubr.bf16.mxu0 %v3057_v2  ;;  %1978 = vmatprep.subr.bf16.mxu1 %v3319_v0  ;;  %v3075_v0 = vld [vmem:[%s3548_s24 + $0xe4] ss:$16 sps:$4 sm:$0xff]   ;;  %s3187_s24 = scalar_lea.vmem %s3795_s29, 1024 }
  0xd1   : > { %p3188_p1 = scmp.ne.s32.totalorder %s3795_s29, %s3187_s24  ;;  %p3195_p5 = scmp.lt.s32.totalorder %s3193_s20, %s3187_s24 }
  0xd2   : > { %1405 = vmatmul.mubr.bf16.gmra.mxu1 %v3056_v4 }
  0xd3   : > { %2440 = vmatprep.mubr.msk.bf16.mxu1 %vm694_vm1, %v3063_v5  ;;  %1979 = vmatpush2.bf16.msra.mxu1 %v1849_v6  ;;  %p3189_p11 = pnand %p3188_p1, %p3887_p3  ;;  %p3196_p6 = por %p3195_p5, %p3194_p13 }
  0xd5   : > { %p3190_p0 = pneg %p3189_p11 }
  0xd7   : > { %1316 = vmatmul.mubr.bf16.gmra.mxu0 %v3059_v7  ;;  %p3197_p8 = pnand %p3196_p6, %p3190_p0 }
  0xd8   : > { %1323 = vmatprep.mubr.bf16.mxu0 %v3066_v8 }
  0xda   : > { %1413 = vmatmul.mubr.bf16.gmra.mxu1 %v3065_v9 }
  0xdb   : > { %2441 = vmatprep.mubr.msk.bf16.mxu1 %vm694_vm1, %v3072_v10 }
  0xdf   : > { %1324 = vmatmul.mubr.bf16.gmra.mxu0 %v3068_v11 }
  0xe0   : > { %1331 = vmatprep.mubr.bf16.mxu0 %v3075_v0 }
  0xe2   : > { %1421 = vmatmul.mubr.bf16.gmra.mxu1 %v3074_v12 }
  0xe3   : > { %2442 = vmatprep.mubr.msk.bf16.mxu1 %vm694_vm1, %v3081_v13 }
  0xe7   : > { %1332 = vmatmul.mubr.bf16.gmra.mxu0 %v3078_v14 }
  0xe8   : > { %1883 = vmatprep.mubr.bf16.mxu0 %v3087_v15 }
  0xea   : > { %1429 = vmatmul.mubr.bf16.gmra.mxu1 %v3083_v16 }
  0xeb   : > { %2502 = vmatprep.mubr.msk.bf16.mxu1 %vm694_vm1, %v3090_v17 }
  0xef   : > { %1884 = vmatmul.mubr.bf16.vlgmr.msra.gmra.mxu0 %v3085_v18 }
  0xf0   : > { %1891 = vmatprep.mubr.bf16.mxu0 %v3091_v19 }
  0xf2   : > { %1981 = vmatmul.mubr.bf16.vlgmr.msra.gmra.mxu1 %v3088_v20 }
  0xf3   : > { %2503 = vmatprep.mubr.msk.bf16.mxu1 %vm694_vm1, %v3094_v21 }
  0xf7   : > { %1892 = vmatmul.mubr.bf16.gmra.mxu0 %v3093_v22 }
  0xf8   : > { %1899 = vmatprep.mubr.bf16.mxu0 %v3097_v23 }
  0xfa   : > { %1989 = vmatmul.mubr.bf16.gmra.mxu1 %v3096_v24 }
  0xfb   : > { %2504 = vmatprep.mubr.msk.bf16.mxu1 %vm694_vm1, %v3100_v25 }
  0xff   : > { %1900 = vmatmul.mubr.bf16.gmra.mxu0 %v3099_v26 }
 0x100   : > { %1907 = vmatprep.mubr.bf16.mxu0 %v3103_v27 }
 0x102   : > { %1997 = vmatmul.mubr.bf16.gmra.mxu1 %v3102_v28 }
 0x103   : > { %2505 = vmatprep.mubr.msk.bf16.mxu1 %vm694_vm1, %v3106_v29 }
 0x107   : > { %1908 = vmatmul.mubr.bf16.gmra.mxu0 %v3105_v30 }
 0x108   : > { %1915 = vmatprep.mubr.bf16.mxu0 %v3109_v31 }
 0x10a   : > { %2005 = vmatmul.mubr.bf16.gmra.mxu1 %v3108_v32 }
 0x10b   : > { %2506 = vmatprep.mubr.msk.bf16.mxu1 %vm694_vm1, %v3112_v33 }
 0x10f   : > { %1916 = vmatmul.mubr.bf16.gmra.mxu0 %v3111_v34 }
 0x110   : > { %1923 = vmatprep.mubr.bf16.mxu0 %v3115_v35 }
 0x112   : > { %2013 = vmatmul.mubr.bf16.gmra.mxu1 %v3114_v36 }
 0x113   : > { %2507 = vmatprep.mubr.msk.bf16.mxu1 %vm694_vm1, %v3118_v37 }
 0x117   : > { %1924 = vmatmul.mubr.bf16.gmra.mxu0 %v3117_v38 }
 0x118   : > { %1931 = vmatprep.mubr.bf16.mxu0 %v3121_v39 }
 0x11a   : > { %2021 = vmatmul.mubr.bf16.gmra.mxu1 %v3120_v40 }
 0x11b   : > { %2508 = vmatprep.mubr.msk.bf16.mxu1 %vm694_vm1, %v3124_v41 }
 0x11f   : > { %1932 = vmatmul.mubr.bf16.gmra.mxu0 %v3123_v42 }
 0x120   : > { %1939 = vmatprep.mubr.bf16.mxu0 %v3127_v43 }
 0x122   : > { %2029 = vmatmul.mubr.bf16.gmra.mxu1 %v3126_v44 }
 0x123   : > { %2509 = vmatprep.mubr.msk.bf16.mxu1 %vm694_vm1, %v3130_v45 }
 0x127   : > { %1940 = vmatmul.mubr.bf16.gmra.mxu0 %v3129_v46 }
 0x12a   : > { %2037 = vmatmul.mubr.bf16.gmra.mxu1 %v3132_v47 }
 0x12f   : > { %v2615_v48 = vpop.f32.mrf.mxu0 }
 0x131   : > { %v2616_v49 = vpop.f32.mrf.mxu0 }
 0x132   : > { %v2617_v50 = vadd.f32 %v2616_v49, %v2615_v48  ;;  %v854_v51 = vpop.f32.mrf.mxu1 }
 0x133   : > { %v2618_v52 = vpop.f32.mrf.mxu0 }
 0x134   : > { %v3658_v53 = vadd.f32 %v2617_v50, %v854_v51  ;;  %v856_v54 = vpop.f32.mrf.mxu1 }
 0x135   : > { %v2619_v55 = vpop.f32.mrf.mxu0 }
 0x136   : > { %v2620_v56 = vadd.f32 %v2619_v55, %v2618_v52  ;;  %v857_v57 = vpop.f32.mrf.mxu1 }
 0x137   : > { %v2621_v58 = vpop.f32.mrf.mxu0 }
 0x138   : > { %v3660_v59 = vadd.f32 %v2620_v56, %v857_v57  ;;  %v859_v60 = vpop.f32.mrf.mxu1 }
 0x139   : > { %v2622_v61 = vpop.f32.mrf.mxu0 }
 0x13a   : > { %v2623_v62 = vadd.f32 %v2622_v61, %v2621_v58  ;;  %v862_v63 = vpop.f32.mrf.mxu1 }
 0x13b   : > { %v2624_v1 = vpop.f32.mrf.mxu0 }
 0x13c   : > { %v3662_v2 = vadd.f32 %v2623_v62, %v862_v63  ;;  %v864_v3 = vpop.f32.mrf.mxu1 }
 0x13d   : > { %v2625_v4 = vpop.f32.mrf.mxu0 }
 0x13e   : > { %v2626_v5 = vadd.f32 %v2625_v4, %v2624_v1  ;;  %v865_v6 = vpop.f32.mrf.mxu1 }
 0x13f   : > { %v2627_v7 = vpop.f32.mrf.mxu0 }
 0x140   : > { %v3664_v8 = vadd.f32 %v2626_v5, %v865_v6  ;;  %v867_v9 = vpop.f32.mrf.mxu1 }
 0x141   : > { %v2628_v10 = vpop.f32.mrf.mxu0 }
 0x142   : > { %v2629_v11 = vadd.f32 %v2628_v10, %v2627_v7  ;;  %v870_v0 = vpop.f32.mrf.mxu1 }
 0x143   : > { %v2630_v12 = vpop.f32.mrf.mxu0 }
 0x144   : > { %v3666_v13 = vadd.f32 %v2629_v11, %v870_v0  ;;  %v872_v14 = vpop.f32.mrf.mxu1 }
 0x145   : > { %v2631_v15 = vpop.f32.mrf.mxu0 }
 0x146   : > { %v2632_v16 = vadd.f32 %v2631_v15, %v2630_v12  ;;  %v873_v17 = vpop.f32.mrf.mxu1 }
 0x147   : > { %v2633_v18 = vpop.f32.mrf.mxu0 }
 0x148   : > { %v3668_v19 = vadd.f32 %v2632_v16, %v873_v17  ;;  %v875_v20 = vpop.f32.mrf.mxu1 }
 0x149   : > { %v2634_v21 = vpop.f32.mrf.mxu0 }
 0x14a   : > { %v2635_v22 = vadd.f32 %v2634_v21, %v2633_v18  ;;  %v878_v23 = vpop.f32.mrf.mxu1 }
 0x14b   : > { %v2636_v24 = vpop.f32.mrf.mxu0 }
 0x14c   : > { %v3670_v25 = vadd.f32 %v2635_v22, %v878_v23  ;;  %v880_v26 = vpop.f32.mrf.mxu1 }
 0x14d   : > { %v2637_v27 = vpop.f32.mrf.mxu0 }
 0x14e   : > { %v2638_v28 = vadd.f32 %v2637_v27, %v2636_v24  ;;  %v881_v29 = vpop.f32.mrf.mxu1 }
 0x14f   : > { %v2639_v30 = vpop.f32.mrf.mxu0 }
 0x150   : > { %v3672_v31 = vadd.f32 %v2638_v28, %v881_v29  ;;  %v883_v32 = vpop.f32.mrf.mxu1 }
 0x151   : > { %v2640_v33 = vpop.f32.mrf.mxu0 }
 0x152   : > { %v2641_v34 = vadd.f32 %v2640_v33, %v2639_v30  ;;  %v886_v35 = vpop.f32.mrf.mxu1 }
 0x153   : > { %v2642_v36 = vpop.f32.mrf.mxu0 }
 0x154   : > { %v3674_v37 = vadd.f32 %v2641_v34, %v886_v35  ;;  %v888_v38 = vpop.f32.mrf.mxu1 }
 0x155   : > { %v2643_v39 = vpop.f32.mrf.mxu0 }
 0x156   : > { %v2644_v40 = vadd.f32 %v2643_v39, %v2642_v36  ;;  %v889_v41 = vpop.f32.mrf.mxu1 }
 0x157   : > { %v2645_v42 = vpop.f32.mrf.mxu0 }
 0x158   : > { %v3676_v43 = vadd.f32 %v2644_v40, %v889_v41  ;;  %v891_v44 = vpop.f32.mrf.mxu1 }
 0x159   : > { %v2646_v45 = vpop.f32.mrf.mxu0 }
 0x15a   : > { %v2647_v46 = vadd.f32 %v2646_v45, %v2645_v42  ;;  %v894_v47 = vpop.f32.mrf.mxu1 }
 0x15b   : > { %v2648_v48 = vpop.f32.mrf.mxu0 }
 0x15c   : > { %v3678_v49 = vadd.f32 %v2647_v46, %v894_v47  ;;  %v896_v50 = vpop.f32.mrf.mxu1 }
 0x15d   : > { %v2649_v51 = vpop.f32.mrf.mxu0 }
 0x15e   : > { %v2650_v52 = vadd.f32 %v2649_v51, %v2648_v48  ;;  %v897_v54 = vpop.f32.mrf.mxu1 }
 0x15f   : > { %v2651_v55 = vpop.f32.mrf.mxu0 }
 0x160   : > { %v3680_v56 = vadd.f32 %v2650_v52, %v897_v54  ;;  %v899_v57 = vpop.f32.mrf.mxu1 }
 0x161   : > { %v2652_v58 = vpop.f32.mrf.mxu0 }
 0x162   : > { %v2653_v60 = vadd.f32 %v2652_v58, %v2651_v55  ;;  %v902_v61 = vpop.f32.mrf.mxu1 }
 0x163   : > { %v2654_v62 = vpop.f32.mrf.mxu0 }
 0x164   : > { %v3682_v63 = vadd.f32 %v2653_v60, %v902_v61  ;;  %v904_v1 = vpop.f32.mrf.mxu1 }
 0x165   : > { %v2655_v3 = vpop.f32.mrf.mxu0 }
 0x166   : > { %v2656_v4 = vadd.f32 %v2655_v3, %v2654_v62  ;;  %v905_v5 = vpop.f32.mrf.mxu1 }
 0x167   : > { %v2657_v6 = vpop.f32.mrf.mxu0 }
 0x168   : > { %v3684_v7 = vadd.f32 %v2656_v4, %v905_v5  ;;  %v907_v9 = vpop.f32.mrf.mxu1 }
 0x169   : > { %v2658_v10 = vpop.f32.mrf.mxu0 }
 0x16a   : > { %v2659_v11 = vadd.f32 %v2658_v10, %v2657_v6  ;;  %v910_v0 = vpop.f32.mrf.mxu1 }
 0x16b   : > { %v2660_v12 = vpop.f32.mrf.mxu0 }
 0x16c   : > { %v3686_v14 = vadd.f32 %v2659_v11, %v910_v0  ;;  %v912_v15 = vpop.f32.mrf.mxu1 }
 0x16d   : > { %v2661_v16 = vpop.f32.mrf.mxu0 }
 0x16e   : > { %v2662_v17 = vadd.f32 %v2661_v16, %v2660_v12  ;;  %v913_v18 = vpop.f32.mrf.mxu1 }
 0x16f   : > { %v2679_v20 = vpop.f32.mrf.mxu0 }
 0x170   : > { %v3688_v21 = vadd.f32 %v2662_v17, %v913_v18  ;;  %v915_v22 = vpop.f32.mrf.mxu1 }
 0x171   : > { %v2680_v23 = vpop.f32.mrf.mxu0 }
 0x172   : > { %v2681_v24 = vadd.f32 %v2680_v23, %v2679_v20  ;;  %v1374_v26 = vpop.f32.mrf.mxu1 }
 0x173   : > { %v2682_v27 = vpop.f32.mrf.mxu0 }
 0x174   : > { %v1278_v28 = vadd.f32 %v2681_v24, %v3658_v53  ;;  %v1376_v29 = vpop.f32.mrf.mxu1 }
 0x175   : > { %v2683_v30 = vpop.f32.mrf.mxu0 }
 0x176   : > { %v3691_v32 = vadd.f32 %v1374_v26, %v1278_v28  ;;  %v2684_v33 = vadd.f32 %v2683_v30, %v2682_v27  ;;  %v1377_v34 = vpop.f32.mrf.mxu1 }
 0x177   : > { %v2685_v35 = vpop.f32.mrf.mxu0 }
 0x178   : > { %v1281_v36 = vadd.f32 %v2684_v33, %v3660_v59  ;;  %v1379_v38 = vpop.f32.mrf.mxu1 }
 0x179   : > { %v2686_v39 = vpop.f32.mrf.mxu0 }
 0x17a   : > { %v3694_v40 = vadd.f32 %v1377_v34, %v1281_v36  ;;  %v2687_v41 = vadd.f32 %v2686_v39, %v2685_v35  ;;  %v1382_v42 = vpop.f32.mrf.mxu1 }
 0x17b   : > { %v2688_v44 = vpop.f32.mrf.mxu0 }
 0x17c   : > { %v1286_v45 = vadd.f32 %v2687_v41, %v3662_v2  ;;  %v1384_v46 = vpop.f32.mrf.mxu1 }
 0x17d   : > { %v2689_v53 = vpop.f32.mrf.mxu0 }
 0x17e   : > { %v3697_v47 = vadd.f32 %v1382_v42, %v1286_v45  ;;  %v2690_v48 = vadd.f32 %v2689_v53, %v2688_v44  ;;  %v1385_v50 = vpop.f32.mrf.mxu1 }
 0x17f   : > { %v2691_v51 = vpop.f32.mrf.mxu0 }
 0x180   : > { %v1289_v52 = vadd.f32 %v2690_v48, %v3664_v8  ;;  %v1387_v54 = vpop.f32.mrf.mxu1 }
 0x181   : > { %v2692_v59 = vpop.f32.mrf.mxu0 }
 0x182   : > { %v3700_v55 = vadd.f32 %v1385_v50, %v1289_v52  ;;  %v2693_v57 = vadd.f32 %v2692_v59, %v2691_v51  ;;  %v1390_v58 = vpop.f32.mrf.mxu1 }
 0x183   : > { %v2694_v60 = vpop.f32.mrf.mxu0 }
 0x184   : > { %v1294_v61 = vadd.f32 %v2693_v57, %v3666_v13  ;;  %v1392_v62 = vpop.f32.mrf.mxu1 }
 0x185   : > { %v2695_v2 = vpop.f32.mrf.mxu0 }
 0x186   : > { %v3703_v1 = vadd.f32 %v1390_v58, %v1294_v61  ;;  %v2696_v3 = vadd.f32 %v2695_v2, %v2694_v60  ;;  %v1393_v4 = vpop.f32.mrf.mxu1 }
 0x187   : > { %v2697_v5 = vpop.f32.mrf.mxu0 }
 0x188   : > { %v1297_v6 = vadd.f32 %v2696_v3, %v3668_v19  ;;  %v1395_v9 = vpop.f32.mrf.mxu1 }
 0x189   : > { %v2698_v8 = vpop.f32.mrf.mxu0 }
 0x18a   : > { %v3706_v10 = vadd.f32 %v1393_v4, %v1297_v6  ;;  %v2699_v11 = vadd.f32 %v2698_v8, %v2697_v5  ;;  %v1398_v0 = vpop.f32.mrf.mxu1 }
 0x18b   : > { %v2700_v12 = vpop.f32.mrf.mxu0 }
 0x18c   : > { %v1302_v15 = vadd.f32 %v2699_v11, %v3670_v25  ;;  %v1400_v16 = vpop.f32.mrf.mxu1 }
 0x18d   : > { %v2701_v13 = vpop.f32.mrf.mxu0 }
 0x18e   : > { %v3709_v17 = vadd.f32 %v1398_v0, %v1302_v15  ;;  %v2702_v18 = vadd.f32 %v2701_v13, %v2700_v12  ;;  %v1401_v20 = vpop.f32.mrf.mxu1 }
 0x18f   : > { %v2703_v22 = vpop.f32.mrf.mxu0 }
 0x190   : > { %v1305_v23 = vadd.f32 %v2702_v18, %v3672_v31  ;;  %v1403_v24 = vpop.f32.mrf.mxu1 }
 0x191   : > { %v2704_v19 = vpop.f32.mrf.mxu0 }
 0x192   : > { %v3712_v26 = vadd.f32 %v1401_v20, %v1305_v23  ;;  %v2705_v27 = vadd.f32 %v2704_v19, %v2703_v22  ;;  %v1406_v28 = vpop.f32.mrf.mxu1 }
 0x193   : > { %v2706_v29 = vpop.f32.mrf.mxu0 }
 0x194   : > { %v1310_v30 = vadd.f32 %v2705_v27, %v3674_v37  ;;  %v1408_v33 = vpop.f32.mrf.mxu1 }
 0x195   : > { %v2707_v25 = vpop.f32.mrf.mxu0 }
 0x196   : > { %v3715_v34 = vadd.f32 %v1406_v28, %v1310_v30  ;;  %v2708_v35 = vadd.f32 %v2707_v25, %v2706_v29  ;;  %v1409_v36 = vpop.f32.mrf.mxu1 }
 0x197   : > { %v2709_v38 = vpop.f32.mrf.mxu0 }
 0x198   : > { %v1313_v39 = vadd.f32 %v2708_v35, %v3676_v43  ;;  %v1411_v41 = vpop.f32.mrf.mxu1 }
 0x199   : > { %v2710_v31 = vpop.f32.mrf.mxu0 }
 0x19a   : > { %v3718_v42 = vadd.f32 %v1409_v36, %v1313_v39  ;;  %v2711_v44 = vadd.f32 %v2710_v31, %v2709_v38  ;;  %v1414_v45 = vpop.f32.mrf.mxu1 }
 0x19b   : > { %v2712_v46 = vpop.f32.mrf.mxu0 }
 0x19c   : > { %v1318_v53 = vadd.f32 %v2711_v44, %v3678_v49  ;;  %v1416_v48 = vpop.f32.mrf.mxu1 }
 0x19d   : > { %v2713_v37 = vpop.f32.mrf.mxu0 }
 0x19e   : > { %v3721_v50 = vadd.f32 %v1414_v45, %v1318_v53  ;;  %v2714_v51 = vadd.f32 %v2713_v37, %v2712_v46  ;;  %v1417_v52 = vpop.f32.mrf.mxu1 }
 0x19f   : > { %v2715_v54 = vpop.f32.mrf.mxu0 }
 0x1a0   : > { %v1321_v59 = vadd.f32 %v2714_v51, %v3680_v56  ;;  %v1419_v57 = vpop.f32.mrf.mxu1 }
 0x1a1   : > { %v2716_v43 = vpop.f32.mrf.mxu0 }
 0x1a2   : > { %v3724_v58 = vadd.f32 %v1417_v52, %v1321_v59  ;;  %v2717_v60 = vadd.f32 %v2716_v43, %v2715_v54  ;;  %v1422_v61 = vpop.f32.mrf.mxu1 }
 0x1a3   : > { %v2718_v62 = vpop.f32.mrf.mxu0 }
 0x1a4   : > { %v1326_v2 = vadd.f32 %v2717_v60, %v3682_v63  ;;  %v1424_v3 = vpop.f32.mrf.mxu1 }
 0x1a5   : > { %v2719_v49 = vpop.f32.mrf.mxu0 }
 0x1a6   : > { %v3727_v4 = vadd.f32 %v1422_v61, %v1326_v2  ;;  %v2720_v5 = vadd.f32 %v2719_v49, %v2718_v62  ;;  %v1425_v6 = vpop.f32.mrf.mxu1 }
 0x1a7   : > { %v2721_v9 = vpop.f32.mrf.mxu0 }
 0x1a8   : > { %v1329_v8 = vadd.f32 %v2720_v5, %v3684_v7  ;;  %v1427_v11 = vpop.f32.mrf.mxu1 }
 0x1a9   : > { %v2722_v56 = vpop.f32.mrf.mxu0 }
 0x1aa   : > { %v3730_v0 = vadd.f32 %v1425_v6, %v1329_v8  ;;  %v2723_v12 = vadd.f32 %v2722_v56, %v2721_v9  ;;  %v1430_v15 = vpop.f32.mrf.mxu1 }
 0x1ab   : > { %v2724_v16 = vpop.f32.mrf.mxu0 }
 0x1ac   : > { %v1334_v13 = vadd.f32 %v2723_v12, %v3686_v14  ;;  %v1432_v18 = vpop.f32.mrf.mxu1 }
 0x1ad   : > { %v2725_v63 = vpop.f32.mrf.mxu0 }
 0x1ae   : > { %v3733_v20 = vadd.f32 %v1430_v15, %v1334_v13  ;;  %v2726_v22 = vadd.f32 %v2725_v63, %v2724_v16  ;;  %v1433_v23 = vpop.f32.mrf.mxu1 }
 0x1af   : > { %v2743_v24 = vpop.f32.mrf.mxu0 }
 0x1b0   : > { %v1337_v19 = vadd.f32 %v2726_v22, %v3688_v21  ;;  %v1435_v27 = vpop.f32.mrf.mxu1  ;;  %v3742_v21 = vld [vmem:[%s3862_s2] ss:$0 sm:$0xff] }
 0x1b1   : > { %v2744_v7 = vpop.f32.mrf.mxu0 }
 0x1b2   : > { %v3736_v28 = vadd.f32 %v1433_v23, %v1337_v19  ;;  %v2745_v29 = vadd.f32 %v2744_v7, %v2743_v24  ;;  %v1982_v30 = vpop.f32.mrf.mxu1 }
 0x1b3   : > { %v2746_v33 = vpop.f32.mrf.mxu0 }
 0x1b4   : > { %v1983_v25 = vadd.f32 %v2745_v29, %v1982_v30  ;;  %v1984_v35 = vpop.f32.mrf.mxu1 }
 0x1b5   : > { %v2747_v14 = vpop.f32.mrf.mxu0 }
 0x1b6   : > { %v2045_v36 = vadd.f32 %v1983_v25, %v3691_v32  ;;  %v2748_v38 = vadd.f32 %v2747_v14, %v2746_v33  ;;  %v1985_v39 = vpop.f32.mrf.mxu1 }
 0x1b7   : > { %v2749_v41 = vpop.f32.mrf.mxu0 }
 0x1b8   : > { %v1986_v31 = vadd.f32 %v2748_v38, %v1985_v39  ;;  %v1987_v44 = vpop.f32.mrf.mxu1  ;;  %v2068_v46 = vadd.f32 %v3742_v21, %v2045_v36 }
 0x1b9   : > { %v2750_v45 = vpop.f32.mrf.mxu0 }
 0x1ba   : > { %v2046_v53 = vadd.f32 %v1986_v31, %v3694_v40  ;;  %v2751_v48 = vadd.f32 %v2750_v45, %v2749_v41  ;;  %v1990_v37 = vpop.f32.mrf.mxu1  ;;  %v2084_v57 = vmax.f32 %v2068_v46, 0.0 }
 0x1bb   : > { %v2752_v51 = vpop.f32.mrf.mxu0 }
 0x1bc   : > { %v2069_v32 = vadd.f32 %v3742_v21, %v2046_v53  ;;  %v1991_v52 = vadd.f32 %v2751_v48, %v1990_v37  ;;  %v1992_v54 = vpop.f32.mrf.mxu1 }
 0x1bd   : > { %v2753_v59 = vpop.f32.mrf.mxu0 }
 0x1be   : > { %v2085_v43 = vmax.f32 %v2069_v32, 0.0  ;;  %v2047_v60 = vadd.f32 %v1991_v52, %v3697_v47  ;;  %v2754_v61 = vadd.f32 %v2753_v59, %v2752_v51  ;;  %v1993_v62 = vpop.f32.mrf.mxu1 }
 0x1bf   : > { %v2755_v2 = vpop.f32.mrf.mxu0 }
 0x1c0   : > { %v2555_v3 = vpack.c.bf16 %v2085_v43, %v2084_v57  ;;  %v1994_v49 = vadd.f32 %v2754_v61, %v1993_v62  ;;  %v1995_v40 = vpop.f32.mrf.mxu1  ;;  %v2070_v6 = vadd.f32 %v3742_v21, %v2047_v60 }
 0x1c1   : > { %v2756_v5 = vpop.f32.mrf.mxu0 }
 0x1c2   : > { %2556 = vst [vmem:[%s3751_s7] sm:$0xff] %v2555_v3   ;;  %v2048_v9 = vadd.f32 %v1994_v49, %v3700_v55  ;;  %v2757_v8 = vadd.f32 %v2756_v5, %v2755_v2  ;;  %v1998_v11 = vpop.f32.mrf.mxu1  ;;  %v2086_v13 = vmax.f32 %v2070_v6, 0.0 }
 0x1c3   : > { %v2758_v56 = vpop.f32.mrf.mxu0 }
 0x1c4   : > { %v2071_v47 = vadd.f32 %v3742_v21, %v2048_v9  ;;  %v1999_v12 = vadd.f32 %v2757_v8, %v1998_v11  ;;  %v2000_v15 = vpop.f32.mrf.mxu1 }
 0x1c5   : > { %v2759_v16 = vpop.f32.mrf.mxu0 }
 0x1c6   : > { %v2087_v18 = vmax.f32 %v2071_v47, 0.0  ;;  %v2049_v63 = vadd.f32 %v1999_v12, %v3703_v1  ;;  %v2760_v22 = vadd.f32 %v2759_v16, %v2758_v56  ;;  %v2001_v23 = vpop.f32.mrf.mxu1 }
 0x1c7   : > { %v2761_v24 = vpop.f32.mrf.mxu0 }
 0x1c8   : > { %v2560_v19 = vpack.c.bf16 %v2087_v18, %v2086_v13  ;;  %v2002_v27 = vadd.f32 %v2760_v22, %v2001_v23  ;;  %v2003_v7 = vpop.f32.mrf.mxu1  ;;  %v2072_v29 = vadd.f32 %v3742_v21, %v2049_v63 }
 0x1c9   : > { %v2762_v55 = vpop.f32.mrf.mxu0 }
 0x1ca   : > { %2592 = vst [vmem:[%s3751_s7 + $0x8] sm:$0xff] %v2560_v19   ;;  %v2050_v30 = vadd.f32 %v2002_v27, %v3706_v10  ;;  %v2763_v33 = vadd.f32 %v2762_v55, %v2761_v24  ;;  %v2006_v25 = vpop.f32.mrf.mxu1  ;;  %v2088_v39 = vmax.f32 %v2072_v29, 0.0 }
 0x1cb   : > { %v2764_v35 = vpop.f32.mrf.mxu0 }
 0x1cc   : > { %v2073_v14 = vadd.f32 %v3742_v21, %v2050_v30  ;;  %v2007_v36 = vadd.f32 %v2763_v33, %v2006_v25  ;;  %v2008_v1 = vpop.f32.mrf.mxu1 }
 0x1cd   : > { %v2765_v38 = vpop.f32.mrf.mxu0 }
 0x1ce   : > { %v2089_v41 = vmax.f32 %v2073_v14, 0.0  ;;  %v2051_v31 = vadd.f32 %v2007_v36, %v3709_v17  ;;  %v2766_v44 = vadd.f32 %v2765_v38, %v2764_v35  ;;  %v2009_v45 = vpop.f32.mrf.mxu1 }
 0x1cf   : > { %v2767_v46 = vpop.f32.mrf.mxu0 }
 0x1d0   : > { %v2565_v53 = vpack.c.bf16 %v2089_v41, %v2088_v39  ;;  %v2010_v48 = vadd.f32 %v2766_v44, %v2009_v45  ;;  %v2011_v37 = vpop.f32.mrf.mxu1  ;;  %v2074_v51 = vadd.f32 %v3742_v21, %v2051_v31 }
 0x1d1   : > { %v2768_v10 = vpop.f32.mrf.mxu0 }
 0x1d2   : > { %2593 = vst [vmem:[%s3751_s7 + $0x10] sm:$0xff] %v2565_v53   ;;  %v2052_v32 = vadd.f32 %v2010_v48, %v3712_v26  ;;  %v2769_v52 = vadd.f32 %v2768_v10, %v2767_v46  ;;  %v2014_v54 = vpop.f32.mrf.mxu1  ;;  %v2090_v61 = vmax.f32 %v2074_v51, 0.0 }
 0x1d3   : > { %v2770_v59 = vpop.f32.mrf.mxu0 }
 0x1d4   : > { %v2075_v57 = vadd.f32 %v3742_v21, %v2052_v32  ;;  %v2015_v43 = vadd.f32 %v2769_v52, %v2014_v54  ;;  %v2016_v17 = vpop.f32.mrf.mxu1 }
 0x1d5   : > { %v2771_v60 = vpop.f32.mrf.mxu0 }
 0x1d6   : > { %v2091_v62 = vmax.f32 %v2075_v57, 0.0  ;;  %v2053_v2 = vadd.f32 %v2015_v43, %v3715_v34  ;;  %v2772_v3 = vadd.f32 %v2771_v60, %v2770_v59  ;;  %v2017_v49 = vpop.f32.mrf.mxu1 }
 0x1d7   : > { %v2773_v40 = vpop.f32.mrf.mxu0 }
 0x1d8   : > { %v2570_v5 = vpack.c.bf16 %v2091_v62, %v2090_v61  ;;  %v2018_v6 = vadd.f32 %v2772_v3, %v2017_v49  ;;  %v2019_v9 = vpop.f32.mrf.mxu1  ;;  %v2076_v8 = vadd.f32 %v3742_v21, %v2053_v2 }
 0x1d9   : > { %v2774_v26 = vpop.f32.mrf.mxu0 }
 0x1da   : > { %2594 = vst [vmem:[%s3751_s7 + $0x18] sm:$0xff] %v2570_v5   ;;  %v2054_v11 = vadd.f32 %v2018_v6, %v3718_v42  ;;  %v2775_v56 = vadd.f32 %v2774_v26, %v2773_v40  ;;  %v2022_v47 = vpop.f32.mrf.mxu1  ;;  %v2092_v18 = vmax.f32 %v2076_v8, 0.0 }
 0x1db   : > { %v2776_v12 = vpop.f32.mrf.mxu0 }
 0x1dc   : > { %v2077_v15 = vadd.f32 %v3742_v21, %v2054_v11  ;;  %v2023_v16 = vadd.f32 %v2775_v56, %v2022_v47  ;;  %v2024_v34 = vpop.f32.mrf.mxu1 }
 0x1dd   : > { %v2777_v13 = vpop.f32.mrf.mxu0 }
 0x1de   : > { %v2093_v63 = vmax.f32 %v2077_v15, 0.0  ;;  %v2055_v22 = vadd.f32 %v2023_v16, %v3721_v50  ;;  %v2778_v23 = vadd.f32 %v2777_v13, %v2776_v12  ;;  %v2025_v24 = vpop.f32.mrf.mxu1 }
 0x1df   : > { %v2779_v19 = vpop.f32.mrf.mxu0 }
 0x1e0   : > { %v2575_v27 = vpack.c.bf16 %v2093_v63, %v2092_v18  ;;  %v2026_v7 = vadd.f32 %v2778_v23, %v2025_v24  ;;  %v2027_v55 = vpop.f32.mrf.mxu1  ;;  %v2078_v29 = vadd.f32 %v3742_v21, %v2055_v22 }
 0x1e1   : > { %v2780_v42 = vpop.f32.mrf.mxu0 }
 0x1e2   : > { %2595 = vst [vmem:[%s3751_s7 + $0x20] sm:$0xff] %v2575_v27   ;;  %v2056_v30 = vadd.f32 %v2026_v7, %v3724_v58  ;;  %v2781_v33 = vadd.f32 %v2780_v42, %v2779_v19  ;;  %v2030_v25 = vpop.f32.mrf.mxu1  ;;  %v2094_v38 = vmax.f32 %v2078_v29, 0.0 }
 0x1e3   : > { %v2782_v35 = vpop.f32.mrf.mxu0 }
 0x1e4   : > { %v2079_v14 = vadd.f32 %v3742_v21, %v2056_v30  ;;  %v2031_v36 = vadd.f32 %v2781_v33, %v2030_v25  ;;  %v2032_v50 = vpop.f32.mrf.mxu1 }
 0x1e5   : > { %v2783_v1 = vpop.f32.mrf.mxu0 }
 0x1e6   : > { %v2095_v39 = vmax.f32 %v2079_v14, 0.0  ;;  %v2057_v41 = vadd.f32 %v2031_v36, %v3727_v4  ;;  %v2784_v31 = vadd.f32 %v2783_v1, %v2782_v35  ;;  %v2033_v44 = vpop.f32.mrf.mxu1 }
 0x1e7   : > { %v2785_v45 = vpop.f32.mrf.mxu0 }
 0x1e8   : > { %v2580_v46 = vpack.c.bf16 %v2095_v39, %v2094_v38  ;;  %v2034_v53 = vadd.f32 %v2784_v31, %v2033_v44  ;;  %v2035_v48 = vpop.f32.mrf.mxu1  ;;  %v2080_v37 = vadd.f32 %v3742_v21, %v2057_v41 }
 0x1e9   : > { %v2786_v58 = vpop.f32.mrf.mxu0 }
 0x1ea   : > { %2596 = vst [vmem:[%s3751_s7 + $0x28] sm:$0xff] %v2580_v46   ;;  %v2058_v10 = vadd.f32 %v2034_v53, %v3730_v0  ;;  %v2787_v51 = vadd.f32 %v2786_v58, %v2785_v45  ;;  %v2038_v32 = vpop.f32.mrf.mxu1  ;;  %v2096_v43 = vmax.f32 %v2080_v37, 0.0 }
 0x1eb   : > { %v2788_v52 = vpop.f32.mrf.mxu0 }
 0x1ec   : > { %v2081_v4 = vadd.f32 %v3742_v21, %v2058_v10  ;;  %v2039_v54 = vadd.f32 %v2787_v51, %v2038_v32  ;;  %v2040_v59 = vpop.f32.mrf.mxu1 }
 0x1ed   : > { %v2789_v57 = vpop.f32.mrf.mxu0 }
 0x1ee   : > { %v2097_v17 = vmax.f32 %v2081_v4, 0.0  ;;  %v2059_v60 = vadd.f32 %v2039_v54, %v3733_v20  ;;  %v2790_v61 = vadd.f32 %v2789_v57, %v2788_v52  ;;  %v2041_v62 = vpop.f32.mrf.mxu1 }
 0x1f0   : > { %v2585_v0 = vpack.c.bf16 %v2097_v17, %v2096_v43  ;;  %v2042_v2 = vadd.f32 %v2790_v61, %v2041_v62  ;;  %v2043_v3 = vpop.f32.mrf.mxu1  ;;  %v2082_v49 = vadd.f32 %v3742_v21, %v2059_v60 }
 0x1f2   : > { %2597 = vst [vmem:[%s3751_s7 + $0x30] sm:$0xff] %v2585_v0   ;;  %v2060_v40 = vadd.f32 %v2042_v2, %v3736_v28  ;;  %v2098_v20 = vmax.f32 %v2082_v49, 0.0 }
 0x1f4   : > { %v2083_v5 = vadd.f32 %v3742_v21, %v2060_v40 }
 0x1f6   : > { %v2099_v6 = vmax.f32 %v2083_v5, 0.0 }
 0x1f8   : > { %v2590_v9 = vpack.c.bf16 %v2099_v6, %v2098_v20 }
 0x1fa   : > { %2598 = vst [vmem:[%s3751_s7 + $0x38] sm:$0xff] %v2590_v9  }
 0x1fb   : > { %3200 = shalt.err (!%p3197_p8)
}
 0x1fc   : > { %s3201_s11 = scalar_lea.hbm %s3793_s15, 1024  ;;  %s3205_s5 = scalar_lea.hbm %s3886_s30, 4096 }
 0x1fd   : > { %p3202_p7 = scmp.ne.s32.totalorder %s3793_s15, %s3201_s11  ;;  %p3206_p12 = scmp.lt.s32.totalorder %s3793_s15, %s3886_s30 }
 0x1fe   : > { %p3207_p2 = scmp.lt.s32.totalorder %s3205_s5, %s3201_s11 }
 0x1ff   : > { %p3203_p9 = pnand %p3202_p7, %p3887_p3 }
 0x200   : > { %p3208_p4 = por %p3207_p2, %p3206_p12 }
 0x201   : > { %p3204_p10 = pneg %p3203_p9 }
 0x203   : > { %p3209_p1 = pnand %p3208_p4, %p3204_p10 }
 0x205   : > { %3212 = shalt.err (!%p3209_p1)
}
 0x206   : > { %s3321_s8 = smov 64   ;;  %s3322_s3 = smov 4  }
 0x207   : > { %2800 = dma.vmem_to_hbm [thread:$0]  (%p3887_p3), %s3795_s29, 1024, %s3793_s15, %s3800_s9, %s3321_s8, %s3321_s8, %s3322_s3  }
 0x208 PF: > { %s3888_s25 = sld [smem:[#allocation11_spill]]  ;;  %p2817_p11 = scmp.ge.s32.totalorder %s3311_s22, 2 }
 0x209   : > { %s3889_s27 = sld [smem:[#allocation13_spill]] }
 0x20e   : > { %s2211_s18 = sand.u32 1, %s3888_s25  }
 0x20f   : > { %p3890_p0 = scmp.ne.s32.totalorder %s3889_s27, 0  ;;  %s2212_s19 = scalar_lea.sflag [#allocation4], %s2211_s18 }
 0x211   : > { %p2811_p13 = pnand %p2817_p11, %p3890_p0 }
 0x213   : > { %p2812_p5 = pneg %p2811_p13 }
 0x215   : > { %3266 = dma.done.wait (%p2812_p5), %s2212_s19, 1024  }
 0x216   : > { %3268 = vsyncadd (%p2812_p5), %s2212_s19, 4294966272  ;;  %s20_s22 = sadd.s32 1, %s3311_s22   ;;  %s3891_s18 = sld [smem:[#allocation12_spill]] }
 0x217   : > { %p17_p6 = scmp.ge.s32.totalorder %s20_s22, 6   ;;  %s3892_s20 = sld [smem:[#allocation14_spill]] }
 0x218   : > { %s3893_s28 = sld [smem:[#allocation15_spill]]  ;;  %s3894_s12 = smov %s3275_s13 }
 0x219   : > { %s3895_s13 = smov %s3279_s14  ;;  %s3896_s14 = smov %s3463_s1 }
 0x21a   : > { %s3897_s15 = smov %s3287_s16  ;;  %s3898_s16 = smov %s3291_s17 }
 0x21b   : > { %s3899_s17 = smov %s3458_s10  ;;  %s3900_s19 = smov %s3307_s21 }
 0x21c   :  { %19 = sbr.rel (!%p17_p6) target bundleno = 13 (0xd), region = 86 }
 0x21e   : > { %s3901_s21 = smov %s3893_s28 }
 0x221   :  { %2217 = vsyncpa [#allocation3], 1 }
 0x222   :  { %2219 = vsyncpa [#allocation3 + $0x1], 1 }
 0x223   :  { %2220 = vsyncpa [#allocation6], 1 }
 0x224   :  { %2221 = vsyncpa [#allocation4], 1 }
 0x225   :  { %2223 = vsyncpa [#allocation4 + $0x1], 1 }

</bundles_post_ra>
